<compile_context>
chip_gen: v6e
topology: v6e:2x2x1
jax: 0.10.0
libtpu: 0.0.40
codegen_flags: <defaults>
</compile_context>

<pallas_src>
import functools
import math

import jax
import jax.numpy as jnp
from jax import lax
from jax.experimental import pallas as pl
from jax.experimental.pallas import tpu as pltpu


# --------------------------------------------------------------------------- kernels


def _sdpa_weights_kernel(q_ref, k_ref, v_ref, mask_ref, out_ref, attn_ref, *,
                         scale, matmul_dtype, approx_recip):
    """Full-softmax path (emits attention weights).

    Blocks: q/out (1, TQ, d_k); k/v (1, L, d_k); mask/attn (1, TQ, L).
    """
    q = q_ref[0].astype(matmul_dtype) * jnp.asarray(scale, matmul_dtype)
    k = k_ref[0].astype(matmul_dtype)

    # (q*scale) @ k^T: contract the last dims of both operands (no k relayout), f32 acc.
    scores = lax.dot_general(
        q, k, dimension_numbers=(((1,), (1,)), ((), ())),
        preferred_element_type=jnp.float32)                       # (TQ, L) f32

    # masked_fill_(attn_mask, -1e9)
    scores = jnp.where(mask_ref[0] != 0, jnp.float32(-1e9), scores)

    # Numerically stable softmax over keys, in f32.
    m = jnp.max(scores, axis=-1, keepdims=True)
    e = jnp.exp(scores - m)
    s = jnp.sum(e, axis=-1, keepdims=True)
    w = e * pl.reciprocal(s, approx=approx_recip)                  # (TQ, L) f32

    # Single low-precision cast: feeds both the attn output and the PV matmul.
    w_lp = w.astype(matmul_dtype)
    if jnp.dtype(attn_ref.dtype) == jnp.dtype(matmul_dtype):
        attn_ref[0] = w_lp
    else:
        attn_ref[0] = w.astype(attn_ref.dtype)
    out_ref[0] = jnp.dot(w_lp, v_ref[0].astype(matmul_dtype),
                         preferred_element_type=jnp.float32).astype(out_ref.dtype)


def _sdpa_flash_kernel(q_ref, k_ref, v_ref, mask_ref, out_ref,
                       m_sc, l_sc, acc_sc, *, scale, matmul_dtype, approx_recip):
    """KV-tiled online-softmax path (no attention-weights writeback).

    Blocks: q/out (1, TQ, d_k); k/v (1, TKV, d_k); mask (1, TQ, TKV).
    """
    ki = pl.program_id(2)

    @pl.when(ki == 0)
    def _():
        m_sc[...] = jnp.full_like(m_sc, -jnp.inf)
        l_sc[...] = jnp.zeros_like(l_sc)
        acc_sc[...] = jnp.zeros_like(acc_sc)

    q = q_ref[0].astype(matmul_dtype) * jnp.asarray(scale, matmul_dtype)
    k = k_ref[0].astype(matmul_dtype)
    s = lax.dot_general(q, k, dimension_numbers=(((1,), (1,)), ((), ())),
                        preferred_element_type=jnp.float32)       # (TQ, TKV) f32
    s = jnp.where(mask_ref[0] != 0, jnp.float32(-1e9), s)         # finite fill => safe online max

    m_new = jnp.maximum(m_sc[...], jnp.max(s, axis=-1, keepdims=True))
    alpha = jnp.exp(m_sc[...] - m_new)
    p = jnp.exp(s - m_new)
    l_sc[...] = alpha * l_sc[...] + jnp.sum(p, axis=-1, keepdims=True)
    acc_sc[...] = alpha * acc_sc[...] + jnp.dot(
        p.astype(matmul_dtype), v_ref[0].astype(matmul_dtype),
        preferred_element_type=jnp.float32)
    m_sc[...] = m_new

    @pl.when(ki == pl.num_programs(2) - 1)
    def _():
        out_ref[0] = (acc_sc[...] * pl.reciprocal(l_sc[...], approx=approx_recip)
                      ).astype(out_ref.dtype)


# --------------------------------------------------------------------------- helpers


def _largest_divisor_multiple(L, requested, unit):
    """Largest multiple of `unit` <= requested that divides L, else L (full extent)."""
    t = min(int(requested), L)
    if t >= L:
        return L
    t = (t // unit) * unit
    while t >= unit:
        if L % t == 0:
            return t
        t -= unit
    return L


def _vmem_capacity_bytes():
    try:
        info = pltpu.get_tpu_info()
        for name in ("vmem_capacity_bytes", "vmem_bytes", "vmem_size_bytes"):
            val = getattr(info, name, None)
            if val:
                return int(val)
    except Exception:
        pass
    return 64 << 20   # v7x per-TC capacity; conservative for v5e/v6e (128 MiB).


def _vmem_est_weights(L, tq, d_k, isz):
    blocks = tq * d_k * isz + 2 * L * d_k * isz + tq * L + tq * d_k * isz + tq * L * isz
    working = 4 * tq * L * 4 + tq * L * isz   # f32 scores/e/w intermediates + low-prec copy
    return 2 * blocks + working + (4 << 20)   # double-buffered blocks + Mosaic scratch slack


def _vmem_est_flash(L, tq, tkv, d_k, isz):
    blocks = tq * d_k * isz + 2 * tkv * d_k * isz + tq * tkv + tq * d_k * isz
    working = 4 * tq * tkv * 4 + tq * d_k * 4 + 2 * tq * 4
    return 2 * blocks + working + (4 << 20)


def _vmem_limit(vmem_est, cap):
    # Always set the scoped-VMEM limit explicitly (v5e defaults to only 16 MiB) but keep
    # >= 8 MiB of headroom under the physical per-core capacity (64 MiB on v7x).
    return int(min(cap - (8 << 20), max(2 * vmem_est + (8 << 20), 32 << 20)))


def _normalize_mask(attn_mask, B, H, L):
    """Returns (mask3 int8 [G,L,L], fn: bh -> G index) without broadcasting to B*H."""
    m = attn_mask
    if m.ndim == 2:
        m = m[None, None]
    elif m.ndim == 3:
        m = m[:, None]
    assert m.ndim == 4 and m.shape[2] == L and m.shape[3] == L, m.shape
    mb, mh = m.shape[0], m.shape[1]
    assert mb in (1, B) and mh in (1, H), m.shape
    mask3 = (m != 0).astype(jnp.int8).reshape(mb * mh, L, L)   # safe cast, 1-byte stream
    if mb == 1 and mh == 1:
        idx = lambda bh: 0
    elif mh == 1:                 # (B, 1, L, L): same mask for all heads of a batch
        idx = lambda bh: bh // H
    elif mb == 1:                 # (1, H, L, L): same mask for all batches of a head
        idx = lambda bh: bh % H
    else:                         # (B, H, L, L)
        idx = lambda bh: bh
    return mask3, idx


# --------------------------------------------------------------------------- wrapper


def scaled_dot_product_attention(q, k, v, attn_mask, *, return_weights=True,
                                 block_q=None, block_kv=None, matmul_dtype=None):
    """q, k, v: [B, H, L, d_k]; attn_mask: broadcastable to [B, H, L, L] (nonzero = masked).

    return_weights=True  -> (output, attn_weights), matching the PyTorch module.
    return_weights=False -> output only, via a KV-tiled online-softmax (flash) kernel
                            that never materializes the [B, H, L, L] weights.
    matmul_dtype=None    -> bf16 MXU matmuls for bf16 inputs, f32 otherwise. Pass
                            jnp.bfloat16 to force bf16 matmuls (f32 accumulate/softmax).
    """
    B, H, L, d_k = q.shape
    assert k.shape == (B, H, L, d_k) and v.shape == (B, H, L, d_k)

    if matmul_dtype is None:
        matmul_dtype = jnp.bfloat16 if q.dtype == jnp.bfloat16 else jnp.float32
    approx_recip = jnp.dtype(matmul_dtype) == jnp.dtype(jnp.bfloat16)

    BH = B * H
    qf = q.reshape(BH, L, d_k)
    kf = k.reshape(BH, L, d_k)
    vf = v.reshape(BH, L, d_k)
    maskf, mask_idx = _normalize_mask(attn_mask, B, H, L)

    isz = jnp.dtype(q.dtype).itemsize
    cap = _vmem_capacity_bytes()
    budget = min(48 << 20, int(cap * 0.6))
    scale = 1.0 / math.sqrt(d_k)

    if return_weights:
        # ---------------- full-softmax path (emits attention weights) ----------------
        if block_q is None:
            block_q = 256 if L <= 2048 else (128 if L <= 4096 else 64)  # TQ*L*4 ~ 1-4 MiB
        tq = _largest_divisor_multiple(L, block_q, 32)
        while _vmem_est_weights(L, tq, d_k, isz) > budget and tq > 32:
            nxt = _largest_divisor_multiple(L, max(32, tq // 2), 32)
            if nxt >= tq:
                break
            tq = nxt
        num_q = L // tq
        vmem_est = _vmem_est_weights(L, tq, d_k, isz)

        kernel = functools.partial(_sdpa_weights_kernel, scale=scale,
                                   matmul_dtype=matmul_dtype, approx_recip=approx_recip)
        in_specs = [
            pl.BlockSpec((1, tq, d_k), lambda bh, qi: (bh, qi, 0)),          # q
            pl.BlockSpec((1, L, d_k), lambda bh, qi: (bh, 0, 0)),            # k (per-head resident)
            pl.BlockSpec((1, L, d_k), lambda bh, qi: (bh, 0, 0)),            # v (per-head resident)
            pl.BlockSpec((1, tq, L), lambda bh, qi: (mask_idx(bh), qi, 0)),  # mask (broadcast dedup)
        ]
        out_specs = [
            pl.BlockSpec((1, tq, d_k), lambda bh, qi: (bh, qi, 0)),          # output
            pl.BlockSpec((1, tq, L), lambda bh, qi: (bh, qi, 0)),            # attn weights (lane-dense)
        ]
        out, attn = pl.pallas_call(
            kernel,
            out_shape=(jax.ShapeDtypeStruct((BH, L, d_k), q.dtype),
                       jax.ShapeDtypeStruct((BH, L, L), q.dtype)),
            grid_spec=pltpu.PrefetchScalarGridSpec(
                num_scalar_prefetch=0, grid=(BH, num_q),
                in_specs=in_specs, out_specs=out_specs),
            compiler_params=pltpu.CompilerParams(
                # qi "arbitrary" biases megacore sharding onto the bh axis so the two
                # TensorCores don't both DMA the same head's K/V.
                dimension_semantics=("parallel", "arbitrary"),
                vmem_limit_bytes=_vmem_limit(vmem_est, cap)),
        )(qf, kf, vf, maskf)
        return out.reshape(B, H, L, d_k), attn.reshape(B, H, L, L)

    # ---------------- flash path: online softmax, no weights writeback ----------------
    if block_kv is None:
        block_kv = 512
    tkv = _largest_divisor_multiple(L, block_kv, 128)
    if block_q is None:
        block_q = 256
    tq = _largest_divisor_multiple(L, block_q, 32)
    while _vmem_est_flash(L, tq, tkv, d_k, isz) > budget and tq > 32:
        nxt = _largest_divisor_multiple(L, max(32, tq // 2), 32)
        if nxt >= tq:
            break
        tq = nxt
    num_q, num_kv = L // tq, L // tkv
    vmem_est = _vmem_est_flash(L, tq, tkv, d_k, isz)

    kernel = functools.partial(_sdpa_flash_kernel, scale=scale,
                               matmul_dtype=matmul_dtype, approx_recip=approx_recip)
    in_specs = [
        pl.BlockSpec((1, tq, d_k), lambda bh, qi, ki: (bh, qi, 0)),             # q
        pl.BlockSpec((1, tkv, d_k), lambda bh, qi, ki: (bh, ki, 0)),            # k
        pl.BlockSpec((1, tkv, d_k), lambda bh, qi, ki: (bh, ki, 0)),            # v
        pl.BlockSpec((1, tq, tkv), lambda bh, qi, ki: (mask_idx(bh), qi, ki)),  # mask
    ]
    out_specs = pl.BlockSpec((1, tq, d_k), lambda bh, qi, ki: (bh, qi, 0))      # resident across ki
    out = pl.pallas_call(
        kernel,
        out_shape=jax.ShapeDtypeStruct((BH, L, d_k), q.dtype),
        grid_spec=pltpu.PrefetchScalarGridSpec(
            num_scalar_prefetch=0, grid=(BH, num_q, num_kv),
            in_specs=in_specs, out_specs=out_specs,
            scratch_shapes=[pltpu.VMEM((tq, 1), jnp.float32),     # running max
                            pltpu.VMEM((tq, 1), jnp.float32),     # running denom
                            pltpu.VMEM((tq, d_k), jnp.float32)]), # f32 accumulator
        compiler_params=pltpu.CompilerParams(
            dimension_semantics=("parallel", "arbitrary", "arbitrary"),
            vmem_limit_bytes=_vmem_limit(vmem_est, cap)),
    )(qf, kf, vf, maskf)
    return out.reshape(B, H, L, d_k)


# --------------------------------------------------------------------------- reference / test


def _reference(q, k, v, attn_mask, d_k):
    scores = jnp.einsum("bhqd,bhkd->bhqk", q, k, precision="highest") / math.sqrt(d_k)
    scores = jnp.where(attn_mask != 0, -1e9, scores)
    w = jax.nn.softmax(scores, axis=-1)
    out = jnp.einsum("bhqk,bhkd->bhqd", w, v, precision="highest")
    return out, w


if __name__ == "__main__":
    B, H, L, d_k = 2, 2, 256, 32

    key = jax.random.PRNGKey(0)
    kq, kk, kv_ = jax.random.split(key, 3)
    q = jax.random.normal(kq, (B, H, L, d_k), dtype=jnp.float32)
    k = jax.random.normal(kk, (B, H, L, d_k), dtype=jnp.float32)
    v = jax.random.normal(kv_, (B, H, L, d_k), dtype=jnp.float32)

    # Broadcast causal mask [1, 1, L, L] (True above the diagonal = masked).
    causal = jnp.triu(jnp.ones((L, L), dtype=jnp.bool_), k=1)
    mask_bc = causal[None, None]

    # Per-batch mask [B, 1, L, L]: causal + key padding on the last 32 keys of batch 0.
    key_pad = jnp.zeros((B, L), dtype=jnp.bool_).at[0, L - 32:].set(True)
    mask_b = causal[None, None] | key_pad[:, None, None, :]

    # 1) f32 weights path, broadcast mask (single [1,L,L] int8 mask stream).
    ref_out, ref_w = _reference(q, k, v, mask_bc, d_k)
    out, attn_w = scaled_dot_product_attention(q, k, v, mask_bc, block_q=128)
    jax.block_until_ready((out, attn_w))
    assert jnp.allclose(out, ref_out, atol=2e-4, rtol=2e-4)
    assert jnp.allclose(attn_w, ref_w, atol=2e-4, rtol=2e-4)

    # 2) f32 weights path, per-batch mask ([B,1,L,L] streamed without B*H broadcast).
    ref_out_b, ref_w_b = _reference(q, k, v, mask_b, d_k)
    out_b, attn_w_b = scaled_dot_product_attention(q, k, v, mask_b, block_q=128)
    jax.block_until_ready((out_b, attn_w_b))
    assert jnp.allclose(out_b, ref_out_b, atol=2e-4, rtol=2e-4)
    assert jnp.allclose(attn_w_b, ref_w_b, atol=2e-4, rtol=2e-4)

    # 3) bf16 weights path (bf16 MXU matmuls, f32 softmax) — loose sanity check vs f32 ref.
    qb, kb, vb = (t.astype(jnp.bfloat16) for t in (q, k, v))
    out16, attn16 = scaled_dot_product_attention(qb, kb, vb, mask_bc)
    jax.block_until_ready((out16, attn16))
    assert jnp.allclose(out16.astype(jnp.float32), ref_out, atol=1e-1, rtol=1e-1)
    assert jnp.allclose(attn16.astype(jnp.float32), ref_w, atol=1e-1, rtol=1e-1)

    # 4) flash path (no attn-weights output), KV tiled into 2 blocks.
    out_f = scaled_dot_product_attention(q, k, v, mask_bc, return_weights=False,
                                         block_q=128, block_kv=128)
    jax.block_until_ready(out_f)
    assert jnp.allclose(out_f, ref_out, atol=2e-4, rtol=2e-4)

    print("KERNEL_OK")
</pallas_src>

<mosaic_0001>
module attributes {stable_mosaic.version = 11 : i64} {
  func.func @_sdpa_weights_kernel(%arg0: i32, %arg1: i32, %arg2: memref<1x128x32xf32, #tpu.memory_space<vmem>>, %arg3: memref<1x256x32xf32, #tpu.memory_space<vmem>>, %arg4: memref<1x256x32xf32, #tpu.memory_space<vmem>>, %arg5: memref<1x128x256xi8, #tpu.memory_space<vmem>>, %arg6: memref<1x128x32xf32, #tpu.memory_space<vmem>>, %arg7: memref<1x128x256xf32, #tpu.memory_space<vmem>>) attributes {dimension_semantics = [#tpu.dimension_semantics<parallel>, #tpu.dimension_semantics<arbitrary>], iteration_bounds = array<i64: 4, 2>, scalar_prefetch = 0 : i64, scratch_operands = 0 : i64, tpu.core_type = #tpu.core_type<tc>, window_params = [{transform_indices = @transform_0, window_bounds = array<i64: 1, 128, 32>}, {transform_indices = @transform_1, window_bounds = array<i64: 1, 256, 32>}, {transform_indices = @transform_2, window_bounds = array<i64: 1, 256, 32>}, {transform_indices = @transform_3, window_bounds = array<i64: 1, 128, 256>}, {transform_indices = @transform_4, window_bounds = array<i64: 1, 128, 32>}, {transform_indices = @transform_5, window_bounds = array<i64: 1, 128, 256>}]} {
    %c0 = arith.constant 0 : index
    %c0_0 = arith.constant 0 : index
    %c0_1 = arith.constant 0 : index
    %0 = vector.load %arg2[%c0, %c0_0, %c0_1] : memref<1x128x32xf32, #tpu.memory_space<vmem>>, vector<1x128x32xf32>
    %1 = vector.shape_cast %0 : vector<1x128x32xf32> to vector<128x32xf32>
    %cst = arith.constant 0.176776692 : f32
    %2 = vector.broadcast %cst : f32 to vector<128x32xf32>
    %3 = arith.mulf %1, %2 : vector<128x32xf32>
    %c0_2 = arith.constant 0 : index
    %c0_3 = arith.constant 0 : index
    %c0_4 = arith.constant 0 : index
    %4 = vector.load %arg3[%c0_2, %c0_3, %c0_4] : memref<1x256x32xf32, #tpu.memory_space<vmem>>, vector<1x256x32xf32>
    %5 = vector.shape_cast %4 : vector<1x256x32xf32> to vector<256x32xf32>
    %cst_5 = arith.constant dense<0.000000e+00> : vector<128x256xf32>
    %6 = tpu.matmul %3, %5, %cst_5 {dimension_numbers = #tpu.dot_dimension_numbers<[1], [1], [0], [0], [0, 0, 1, 0], [], []>} : vector<128x32xf32>, vector<256x32xf32>, vector<128x256xf32> -> vector<128x256xf32>
    %c0_6 = arith.constant 0 : index
    %c0_7 = arith.constant 0 : index
    %c0_8 = arith.constant 0 : index
    %7 = vector.load %arg5[%c0_6, %c0_7, %c0_8] : memref<1x128x256xi8, #tpu.memory_space<vmem>>, vector<1x128x256xi8>
    %8 = vector.shape_cast %7 : vector<1x128x256xi8> to vector<128x256xi8>
    %c0_i8 = arith.constant 0 : i8
    %9 = vector.broadcast %c0_i8 : i8 to vector<128x256xi8>
    %10 = arith.cmpi ne, %8, %9 : vector<128x256xi8>
    %cst_9 = arith.constant -1.000000e+09 : f32
    %11 = vector.broadcast %cst_9 : f32 to vector<128x256xf32>
    %12 = arith.select %10, %11, %6 : vector<128x256xi1>, vector<128x256xf32>
    %cst_10 = arith.constant dense<0xFF800000> : vector<128xf32>
    %13 = vector.multi_reduction <maximumf>, %12, %cst_10 [1] : vector<128x256xf32> to vector<128xf32>
    %14 = vector.shape_cast %13 : vector<128xf32> to vector<128x1xf32>
    %15 = vector.broadcast %14 : vector<128x1xf32> to vector<128x256xf32>
    %16 = arith.subf %12, %15 : vector<128x256xf32>
    %17 = math.exp %16 : vector<128x256xf32>
    %cst_11 = arith.constant dense<0.000000e+00> : vector<128xf32>
    %18 = vector.multi_reduction <add>, %17, %cst_11 [1] : vector<128x256xf32> to vector<128xf32>
    %19 = vector.shape_cast %18 : vector<128xf32> to vector<128x1xf32>
    %20 = tpu.reciprocal %19 : vector<128x1xf32> -> vector<128x1xf32>
    %21 = vector.broadcast %20 : vector<128x1xf32> to vector<128x256xf32>
    %22 = arith.mulf %17, %21 : vector<128x256xf32>
    %c0_12 = arith.constant 0 : index
    %c0_13 = arith.constant 0 : index
    %c0_14 = arith.constant 0 : index
    %23 = vector.load %arg7[%c0_12, %c0_13, %c0_14] : memref<1x128x256xf32, #tpu.memory_space<vmem>>, vector<1x128x256xf32>
    %24 = vector.shape_cast %23 : vector<1x128x256xf32> to vector<128x256xf32>
    %25 = vector.shape_cast %22 : vector<128x256xf32> to vector<1x128x256xf32>
    tpu.vector_store %arg7[%c0_12, %c0_13, %c0_14], %25 {strides = array<i32>} : memref<1x128x256xf32, #tpu.memory_space<vmem>>, vector<1x128x256xf32>,
    %c0_15 = arith.constant 0 : index
    %c0_16 = arith.constant 0 : index
    %c0_17 = arith.constant 0 : index
    %26 = vector.load %arg4[%c0_15, %c0_16, %c0_17] : memref<1x256x32xf32, #tpu.memory_space<vmem>>, vector<1x256x32xf32>
    %27 = vector.shape_cast %26 : vector<1x256x32xf32> to vector<256x32xf32>
    %cst_18 = arith.constant dense<0.000000e+00> : vector<128x32xf32>
    %28 = tpu.matmul %22, %27, %cst_18 {dimension_numbers = #tpu.dot_dimension_numbers<[1], [0], [0], [1], [0, 0, 1, 1], [], []>} : vector<128x256xf32>, vector<256x32xf32>, vector<128x32xf32> -> vector<128x32xf32>
    %c0_19 = arith.constant 0 : index
    %c0_20 = arith.constant 0 : index
    %c0_21 = arith.constant 0 : index
    %29 = vector.load %arg6[%c0_19, %c0_20, %c0_21] : memref<1x128x32xf32, #tpu.memory_space<vmem>>, vector<1x128x32xf32>
    %30 = vector.shape_cast %29 : vector<1x128x32xf32> to vector<128x32xf32>
    %31 = vector.shape_cast %28 : vector<128x32xf32> to vector<1x128x32xf32>
    tpu.vector_store %arg6[%c0_19, %c0_20, %c0_21], %31 {strides = array<i32>} : memref<1x128x32xf32, #tpu.memory_space<vmem>>, vector<1x128x32xf32>,
    return
  }
  func.func @transform_0(%arg0: i32, %arg1: i32) -> (i32, i32, i32) {
    %c0_i32 = arith.constant 0 : i32
    %c0_i32_0 = arith.constant 0 : i32
    return %arg0, %arg1, %c0_i32 : i32, i32, i32
  }
  func.func @transform_1(%arg0: i32, %arg1: i32) -> (i32, i32, i32) {
    %c0_i32 = arith.constant 0 : i32
    %c0_i32_0 = arith.constant 0 : i32
    %c0_i32_1 = arith.constant 0 : i32
    return %arg0, %c0_i32, %c0_i32_0 : i32, i32, i32
  }
  func.func @transform_2(%arg0: i32, %arg1: i32) -> (i32, i32, i32) {
    %c0_i32 = arith.constant 0 : i32
    %c0_i32_0 = arith.constant 0 : i32
    %c0_i32_1 = arith.constant 0 : i32
    return %arg0, %c0_i32, %c0_i32_0 : i32, i32, i32
  }
  func.func @transform_3(%arg0: i32, %arg1: i32) -> (i32, i32, i32) {
    %c0_i32 = arith.constant 0 : i32
    %c0_i32_0 = arith.constant 0 : i32
    %c0_i32_1 = arith.constant 0 : i32
    return %c0_i32, %arg1, %c0_i32_0 : i32, i32, i32
  }
  func.func @transform_4(%arg0: i32, %arg1: i32) -> (i32, i32, i32) {
    %c0_i32 = arith.constant 0 : i32
    %c0_i32_0 = arith.constant 0 : i32
    return %arg0, %arg1, %c0_i32 : i32, i32, i32
  }
  func.func @transform_5(%arg0: i32, %arg1: i32) -> (i32, i32, i32) {
    %c0_i32 = arith.constant 0 : i32
    %c0_i32_0 = arith.constant 0 : i32
    return %arg0, %arg1, %c0_i32 : i32, i32, i32
  }
}

</mosaic_0001>

<bundles_post_ra>
// kernel: tpu_custom_call.1
= control target key start
LH: loop header
LB: loop body
LE: loop exit
PB: predicated region body
PF: predicated region fallthrough
CT: control target
= control target key end

     0   :  { %s2846_s0 = inlined_call_operand.vmem [shape: f32[4,256,32], index: 0, kind: input, shape index: {}]   ;;  %s2847_s1 = inlined_call_operand.vmem [shape: f32[4,256,32], index: 1, kind: input, shape index: {}]   ;;  %s2848_s2 = inlined_call_operand.vmem [shape: f32[4,256,32], index: 2, kind: input, shape index: {}]   ;;  %s2849_s3 = inlined_call_operand.vmem [shape: s8[1,256,256], index: 3, kind: input, shape index: {}]   ;;  %s2850_s4 = inlined_call_operand.vmem [shape: f32[4,256,32], index: 4, kind: output, shape index: {0}]   ;;  %s2851_s5 = inlined_call_operand.hbm [shape: f32[4,256,256], index: 5, kind: output, shape index: {1}]  }
   0x1   :  { %2853 = sst [smem:[#allocation5_spill]] %s2846_s0 }
   0x2   :  { %11 = vsyncpa [#allocation3], 0 }
   0x3   :  { %13 = vsyncpa [#allocation3 + $0x1], 0  ;;  %s2101_s18 = smov 0   ;;  %s2103_s19 = smov 0  }
   0x4   :  { %s2105_s20 = smov 0   ;;  %s2107_s21 = smov 0  }
   0x5   :  { %s2109_s22 = smov 0   ;;  %s2111_s23 = smov 0  }
   0x6   :  { %s2113_s24 = smov 0   ;;  %s2115_s25 = smov 0  }
   0x7 LB: > { %s1581_s26 = sadd.s32 4294967295, %s2065_s25   ;;  %s1582_s27 = sadd.s32 4294967294, %s2065_s25   ;;  %s2065_s25 = sphi %s2115_s25, %s19_s25   ;;  %s2061_s24 = sphi %s2113_s24, %s2874_s24   ;;  %s2057_s23 = sphi %s2111_s23, %s2873_s23   ;;  %s2053_s22 = sphi %s2109_s22, %s2872_s22   ;;  %s2049_s21 = sphi %s2107_s21, %s2871_s21   ;;  %s2045_s20 = sphi %s2105_s20, %s2870_s20   ;;  %s2041_s19 = sphi %s2103_s19, %s2869_s19   ;;  %s2037_s18 = sphi %s2101_s18, %s2868_s18  }
   0x8   : > { %s28_s28 = sadd.s32 1, %s2057_s23  ;;  %s31_s29 = sadd.s32 1, %s2061_s24 }
   0x9   : > { %p29_p0 = scmp.ge.s32.totalorder %s28_s28, 2  ;;  %p184_p1 = scmp.ne.s32.totalorder %s2045_s20, %s2041_s19 }
   0xa   : > { %p185_p2 = scmp.eq.s32.totalorder %s1581_s26, 7  ;;  %p190_p5 = scmp.ne.s32.totalorder %s2041_s19, %s2037_s18 }
   0xb   : > { %s2876_s28 = smov (%p29_p0, %s28_s28), 0  ;;  %s2878_s29 = smov (!%p29_p0, %s31_s29), %s2061_s24 }
   0xc   : > { %s170_s30 = ssub.s32 %s2057_s23, %s2876_s28  ;;  %p2152_p3 = por %p185_p2, %p184_p1 }
   0xd   : > { %p33_p4 = scmp.ge.s32.totalorder %s2878_s29, 4  ;;  %p191_p6 = scmp.eq.s32.totalorder %s1582_s27, 7 }
   0xe   : > { %p1585_p7 = scmp.ge.s32.totalorder %s2065_s25, 1  ;;  %p248_p9 = scmp.lt.s32.totalorder %s2065_s25, 9 }
   0xf   : > { %s2880_s29 = smov (%p33_p4, %s2878_s29), 0  ;;  %p2161_p8 = por %p191_p6, %p190_p5 }
  0x10   : > { %s169_s8 = ssub.s32 %s2061_s24, %s2880_s29  ;;  %s174_s9 = sadd.s32 1, %s2045_s20 }
  0x11   : > { %s171_s10 = sor.u32 %s170_s30, %s169_s8  ;;  %p249_p10 = pnand %p1585_p7, %p248_p9 }
  0x12   : > { %p172_p11 = scmp.eq.s32.totalorder %s171_s10, 0  ;;  %p306_p12 = scmp.lt.s32.totalorder (!%p249_p10), %s2053_s22, 3 }
  0x13   : > { %252 = sbr.rel (%p249_p10) target bundleno = 863 (0x35f), region = 36  ;;  %s1587_s12 = sshll.u32 (!%p249_p10), %s2049_s21, 4 }
  0x14   : > { %s2170_s11 = scalar_select %p172_p11, %s2045_s20, %s174_s9  }
  0x15   : > { %p308_p13 = scmp.lt.s32.totalorder (!%p249_p10), %s1587_s12, 31  ;;  %s2856_s0 = sld [smem:[#allocation5_spill]] (!%p249_p10) }
  0x16   : > { %s1651_s16 = sshll.u32 (!%p249_p10), %s2053_s22, 6 }
  0x18   : > { %s2175_s13 = scalar_select %p306_p12, %s2053_s22, 3  ;;  %vm409_vm0 = vcmask 261120  }
  0x19   : > { %s2882_s12 = smov (!%p308_p13, %s1587_s12), 31 }
  0x1a   : > { %s1655_s14 = sshll.u32 %s2175_s13, 8  ;;  %s1588_s15 = sshll.u32 %s2175_s13, 5 }
  0x1b   : > { %s2184_s26 = scalar_lea.vmem %s2847_s1, %s1655_s14  ;;  %s2190_s27 = sadd.s32 %s1588_s15, %s2882_s12 }
  0x1c   : > { %v408_v0 = vld [vmem:[%s2184_s26 + $0xf8] sm:$0xff]  ;;  %v407_v2 = vld [vmem:[%s2184_s26 + $0xf0] sm:$0xff]  ;;  %v406_v4 = vld [vmem:[%s2184_s26 + $0xe8] sm:$0xff]  ;;  %s2852_s30 = sshll.u32 %s2190_s27, 3  ;;  %s1594_s12 = sshll.u32 %s2049_s21, 2 }
  0x1d   : > { %v392_v1 = vld [vmem:[%s2184_s26 + $0x78] sm:$0xff]  ;;  %1659 = vmatprep.subr.msk.mxu0 %vm409_vm0, %v408_v0  ;;  %v391_v3 = vld [vmem:[%s2184_s26 + $0x70] sm:$0xff]  ;;  %v390_v5 = vld [vmem:[%s2184_s26 + $0x68] sm:$0xff]  ;;  %s2205_s10 = scalar_lea.vmem %s2856_s0, %s2852_s30  ;;  %p326_p0 = scmp.lt.s32.totalorder %s1594_s12, 7 }
  0x1e   : > { %1660 = vmatpush3.xpose.msk.msra.mxu0 %vm409_vm0, %v392_v1  ;;  %v405_v6 = vld [vmem:[%s2184_s26 + $0xe0] sm:$0xff]  ;;  %v404_v10 = vld [vmem:[%s2184_s26 + $0xd8] sm:$0xff]  ;;  %v403_v12 = vld [vmem:[%s2184_s26 + $0xd0] sm:$0xff]  ;;  %s302_s13 = sand.u32 1, %s2041_s19  }
  0x1f   : > { %1661 = vmatprep.subr.msk.mxu0 %vm409_vm0, %v407_v2  ;;  %v345_v7 = vld [vmem:[%s2205_s10] sm:$0xff]  ;;  %v388_v11 = vld [vmem:[%s2184_s26 + $0x58] sm:$0xff]  ;;  %v387_v13 = vld [vmem:[%s2184_s26 + $0x50] sm:$0xff]  ;;  %s2884_s12 = smov (!%p326_p0, %s1594_s12), 7  ;;  %v2067_v2 = vmov 0   ;;  %s2756_s30 = scalar_lea.sflag [#allocation3], %s302_s13 }
  0x20   : > { %v389_v8 = vld [vmem:[%s2184_s26 + $0x60] sm:$0xff]  ;;  %v361_v9 = vmul.f32 0.17677669, %v345_v7  ;;  %v402_v14 = vld [vmem:[%s2184_s26 + $0xc8] sm:$0xff]  ;;  %v400_v18 = vld [vmem:[%s2184_s26 + $0xb8] sm:$0xff]  ;;  %s1657_s15 = sshll.u32 %s2884_s12, 4 }
  0x21   : > { %v386_v15 = vld [vmem:[%s2184_s26 + $0x48] sm:$0xff]  ;;  %v401_v16 = vld [vmem:[%s2184_s26 + $0xc0] sm:$0xff]  ;;  %v384_v19 = vld [vmem:[%s2184_s26 + $0x38] sm:$0xff] }
  0x22   : > { %1662 = vmatpush3.xpose.msk.msra.mxu0 %vm409_vm0, %v391_v3  ;;  %1691 = vmatprep.mubr.msk.f32.mxu0 %vm409_vm0, %v361_v9  ;;  %v385_v17 = vld [vmem:[%s2184_s26 + $0x40] sm:$0xff]  ;;  %v399_v20 = vld [vmem:[%s2184_s26 + $0xb0] sm:$0xff]  ;;  %v398_v22 = vld [vmem:[%s2184_s26 + $0xa8] sm:$0xff] }
  0x23   : > { %1663 = vmatprep.subr.msk.mxu0 %vm409_vm0, %v406_v4  ;;  %v383_v21 = vld [vmem:[%s2184_s26 + $0x30] sm:$0xff]  ;;  %v382_v23 = vld [vmem:[%s2184_s26 + $0x28] sm:$0xff]  ;;  %v397_v24 = vld [vmem:[%s2184_s26 + $0xa0] sm:$0xff] }
  0x24   : > { %v381_v25 = vld [vmem:[%s2184_s26 + $0x20] sm:$0xff]  ;;  %v396_v26 = vld [vmem:[%s2184_s26 + $0x98] sm:$0xff]  ;;  %v395_v28 = vld [vmem:[%s2184_s26 + $0x90] sm:$0xff] }
  0x25   : > { %v380_v27 = vld [vmem:[%s2184_s26 + $0x18] sm:$0xff]  ;;  %v379_v29 = vld [vmem:[%s2184_s26 + $0x10] sm:$0xff]  ;;  %v394_v30 = vld [vmem:[%s2184_s26 + $0x88] sm:$0xff] }
  0x26   : > { %1664 = vmatpush3.xpose.msk.msra.mxu0 %vm409_vm0, %v390_v5  ;;  %v378_v31 = vld [vmem:[%s2184_s26 + $0x8] sm:$0xff]  ;;  %v393_v32 = vld [vmem:[%s2184_s26 + $0x80] sm:$0xff]  ;;  %v347_v36 = vld [vmem:[%s2205_s10 + $0x10] sm:$0xff] }
  0x27   : > { %1665 = vmatprep.subr.msk.mxu0 %vm409_vm0, %v405_v6  ;;  %v377_v33 = vld [vmem:[%s2184_s26] sm:$0xff]  ;;  %v346_v34 = vld [vmem:[%s2205_s10 + $0x8] sm:$0xff]  ;;  %v363_v37 = vmul.f32 0.17677669, %v347_v36  ;;  %v348_v38 = vld [vmem:[%s2205_s10 + $0x18] sm:$0xff]  ;;  %s2312_s26 = scalar_lea.vmem %s2849_s3, %s1657_s15  ;;  %s1658_s15 = sshll.u32 %s2049_s21, 5 }
  0x28   : > { %v362_v35 = vmul.f32 0.17677669, %v346_v34  ;;  %v364_v39 = vmul.f32 0.17677669, %v348_v38  ;;  %v349_v40 = vld [vmem:[%s2205_s10 + $0x20] sm:$0xff]  ;;  %v350_v42 = vld [vmem:[%s2205_s10 + $0x28] sm:$0xff]  ;;  %s1423_s17 = sadd.s32 %s1658_s15, %s1651_s16 }
  0x29   : > { %v365_v41 = vmul.f32 0.17677669, %v349_v40  ;;  %v366_v43 = vmul.f32 0.17677669, %v350_v42  ;;  %v351_v44 = vld [vmem:[%s2205_s10 + $0x30] sm:$0xff]  ;;  %v352_v46 = vld [vmem:[%s2205_s10 + $0x38] sm:$0xff] }
  0x2a   : > { %1666 = vmatpush3.xpose.msk.msra.mxu0 %vm409_vm0, %v389_v8  ;;  %v367_v45 = vmul.f32 0.17677669, %v351_v44  ;;  %v368_v47 = vmul.f32 0.17677669, %v352_v46  ;;  %v353_v48 = vld [vmem:[%s2205_s10 + $0x40] sm:$0xff]  ;;  %v354_v50 = vld [vmem:[%s2205_s10 + $0x48] sm:$0xff] }
  0x2b   : > { %1667 = vmatprep.subr.msk.mxu0 %vm409_vm0, %v404_v10  ;;  %v369_v49 = vmul.f32 0.17677669, %v353_v48  ;;  %v370_v51 = vmul.f32 0.17677669, %v354_v50  ;;  %v355_v52 = vld [vmem:[%s2205_s10 + $0x50] sm:$0xff]  ;;  %v356_v54 = vld [vmem:[%s2205_s10 + $0x58] sm:$0xff] }
  0x2c   : > { %v371_v53 = vmul.f32 0.17677669, %v355_v52  ;;  %v372_v55 = vmul.f32 0.17677669, %v356_v54  ;;  %v357_v56 = vld [vmem:[%s2205_s10 + $0x60] sm:$0xff]  ;;  %v358_v58 = vld [vmem:[%s2205_s10 + $0x68] sm:$0xff] }
  0x2d   : > { %v373_v57 = vmul.f32 0.17677669, %v357_v56  ;;  %v374_v59 = vmul.f32 0.17677669, %v358_v58  ;;  %v359_v60 = vld [vmem:[%s2205_s10 + $0x70] sm:$0xff]  ;;  %v360_v62 = vld [vmem:[%s2205_s10 + $0x78] sm:$0xff]  ;;  %s2513_s10 = scalar_lea.vmem %s2848_s2, %s1655_s14 }
  0x2e   : > { %1668 = vmatpush3.xpose.msk.msra.mxu0 %vm409_vm0, %v388_v11  ;;  %v375_v61 = vmul.f32 0.17677669, %v359_v60  ;;  %v376_v63 = vmul.f32 0.17677669, %v360_v62  ;;  %v715_v0 = vld [vmem:[%s2312_s26] sm:$0xff]  ;;  %v716_v1 = vld [vmem:[%s2312_s26 + $0x8] sm:$0xff] }
  0x2f   : > { %1669 = vmatprep.subr.msk.mxu0 %vm409_vm0, %v403_v12  ;;  %vm723_vm1 = vnez %v715_v0  ;;  %vm724_vm2 = vnez %v716_v1  ;;  %v717_v12 = vld [vmem:[%s2312_s26 + $0x10] sm:$0xff]  ;;  %v720_v42 = vld [vmem:[%s2312_s26 + $0x28] sm:$0xff]  ;;  %s1586_s14 = sshll.u32 %s302_s13, 8  ;;  %s2068_s21 = smov [#allocation2]  }
  0x30   : > { %v731_v3 = vsel %vm723_vm1, 16843009, %v2067_v2  ;;  %v732_v4 = vsel %vm724_vm2, 16843009, %v2067_v2  ;;  %vm725_vm3 = vnez %v717_v12  ;;  %vm728_vm14 = vnez %v720_v42  ;;  %s2680_s12 = scalar_lea.vmem [#allocation2], %s1586_s14  ;;  %s1977_s22 = sshll.u32 %s2068_s21, 4  ;;  %s1978_s22 = int_to_ptr.vmem [resolvable:$false] %s1977_s22 }
  0x31   : > { %v739_v5 = vunpack.c.0.s8 %v731_v3  ;;  %v740_v6 = vunpack.c.0.s8 %v732_v4  ;;  %v741_v8 = vunpack.c.1.s8 %v731_v3  ;;  %v743_v10 = vunpack.c.2.s8 %v731_v3  ;;  %s1426_s8 = sshll.u32 %s2680_s12, 4  ;;  %s2752_s8 = int_to_ptr.vmem [resolvable:$true] %s1426_s8 }
  0x32   : > { %1670 = vmatpush3.xpose.msk.msra.mxu0 %vm409_vm0, %v387_v13  ;;  %v744_v11 = vunpack.c.2.s8 %v732_v4  ;;  %v718_v13 = vld [vmem:[%s2312_s26 + $0x18] sm:$0xff]  ;;  %s1973_s0 = scalar_lea.vmem %s2752_s8, 4096  ;;  %p1980_p5 = scmp.lt.s32.totalorder %s2752_s8, %s1978_s22 }
  0x33   : > { %1671 = vmatprep.subr.msk.mxu0 %vm409_vm0, %v402_v14  ;;  %v771_v7 = vpack.c.b16 %v740_v6, %v739_v5  ;;  %vm726_vm4 = vnez %v718_v13  ;;  %p1974_p1 = scmp.ne.s32.totalorder %s2752_s8, %s1973_s0 }
  0x35   : > { %v772_v14 = vpack.c.b8 %v771_v7, %v771_v7  ;;  %p1975_p2 = pnand %p1974_p1, %p2152_p3 }
  0x36   : > { %1672 = vmatpush3.xpose.msk.msra.mxu0 %vm409_vm0, %v386_v15 }
  0x37   : > { %1673 = vmatprep.subr.msk.mxu0 %vm409_vm0, %v401_v16  ;;  %v775_v16 = vpack.c.b16 %v744_v11, %v743_v10  ;;  %vm803_vm5 = vnez %v772_v14  ;;  %p1976_p4 = pneg %p1975_p2 }
  0x3a   : > { %1674 = vmatpush3.xpose.msk.msra.mxu0 %vm409_vm0, %v385_v17 }
  0x3b   : > { %1675 = vmatprep.subr.msk.mxu0 %vm409_vm0, %v400_v18  ;;  %v745_v18 = vunpack.c.3.s8 %v731_v3 }
  0x3e   : > { %1676 = vmatpush3.xpose.msk.msra.mxu0 %vm409_vm0, %v384_v19  ;;  %v746_v19 = vunpack.c.3.s8 %v732_v4 }
  0x3f   : > { %1677 = vmatprep.subr.msk.mxu0 %vm409_vm0, %v399_v20  ;;  %v2321_v20 = vsel %vm725_vm3, 16843009, %v2067_v2 }
  0x40   : > { %v753_v58 = vunpack.c.3.s8 %v2321_v20 }
  0x42   : > { %1678 = vmatpush3.xpose.msk.msra.mxu0 %vm409_vm0, %v383_v21  ;;  %v2324_v21 = vsel %vm726_vm4, 16843009, %v2067_v2 }
  0x43   : > { %1679 = vmatprep.subr.msk.mxu0 %vm409_vm0, %v398_v22  ;;  %v776_v22 = vpack.c.b8 %v775_v16, %v775_v16  ;;  %v752_v40 = vunpack.c.2.s8 %v2324_v21 }
  0x45   : > { %vm805_vm7 = vnez %v776_v22 }
  0x46   : > { %1680 = vmatpush3.xpose.msk.msra.mxu0 %vm409_vm0, %v382_v23  ;;  %v819_v23 = vsel %vm803_vm5, 16843009, %v2067_v2  ;;  %v821_v36 = vsel %vm805_vm7, 16843009, %v2067_v2 }
  0x47   : > { %1681 = vmatprep.subr.msk.mxu0 %vm409_vm0, %v397_v24  ;;  %v747_v24 = vunpack.c.0.s8 %v2321_v20  ;;  %v840_v48 = vunpack.c.1.s8 %v821_v36 }
  0x49   : > { %vm872_vm2 = vcmp.ne.s32.totalorder %v840_v48, 0 }
  0x4a   : > { %1682 = vmatpush3.xpose.msk.msra.mxu0 %vm409_vm0, %v381_v25  ;;  %v748_v25 = vunpack.c.0.s8 %v2324_v21 }
  0x4b   : > { %1683 = vmatprep.subr.msk.mxu0 %vm409_vm0, %v396_v26  ;;  %v777_v26 = vpack.c.b16 %v746_v19, %v745_v18 }
  0x4e   : > { %1684 = vmatpush3.xpose.msk.msra.mxu0 %vm409_vm0, %v380_v27  ;;  %v835_v27 = vunpack.c.0.s8 %v819_v23 }
  0x4f   : > { %1685 = vmatprep.subr.msk.mxu0 %vm409_vm0, %v395_v28 }
  0x50   : > { %vm867_vm8 = vcmp.ne.s32.totalorder %v835_v27, 0 }
  0x52   : > { %1686 = vmatpush3.xpose.msk.msra.mxu0 %vm409_vm0, %v379_v29  ;;  %v836_v29 = vunpack.c.1.s8 %v819_v23 }
  0x53   : > { %1687 = vmatprep.subr.msk.mxu0 %vm409_vm0, %v394_v30  ;;  %v779_v30 = vpack.c.b16 %v748_v25, %v747_v24 }
  0x54   : > { %vm868_vm9 = vcmp.ne.s32.totalorder %v836_v29, 0 }
  0x55   : > { %v780_v38 = vpack.c.b8 %v779_v30, %v779_v30 }
  0x56   : > { %1688 = vmatpush3.xpose.msk.msra.mxu0 %vm409_vm0, %v378_v31  ;;  %v778_v31 = vpack.c.b8 %v777_v26, %v777_v26 }
  0x57   : > { %1689 = vmatprep.subr.msk.mxu0 %vm409_vm0, %v393_v32  ;;  %v749_v32 = vunpack.c.1.s8 %v2321_v20  ;;  %vm807_vm15 = vnez %v780_v38 }
  0x58   : > { %vm806_vm10 = vnez %v778_v31  ;;  %v823_v1 = vsel %vm807_vm15, 16843009, %v2067_v2  ;;  %v721_v31 = vld [vmem:[%s2312_s26 + $0x30] sm:$0xff] }
  0x59   : > { %v843_v10 = vunpack.c.0.s8 %v823_v1  ;;  %v844_v16 = vunpack.c.1.s8 %v823_v1 }
  0x5a   : > { %1690 = vmatpush3.xpose.msk.msra.mxu0 %vm409_vm0, %v377_v33  ;;  %v750_v33 = vunpack.c.1.s8 %v2324_v21 }
  0x5b   : > { %vm2388_vm7 = vcmp.ne.s32.totalorder %v843_v10, 0 }
  0x5c   : > { %v781_v44 = vpack.c.b16 %v750_v33, %v749_v32  ;;  %v722_v32 = vld [vmem:[%s2312_s26 + $0x38] sm:$0xff] }
  0x5d   : > { %1692 = vmatmul.mubr.msk.f32.vlgmr.msra.gmra.mxu0 %vm409_vm0, %v361_v9  ;;  %v742_v9 = vunpack.c.1.s8 %v732_v4 }
  0x5e   : > { %1693 = vmatprep.mubr.msk.f32.mxu0 %vm409_vm0, %v362_v35  ;;  %v782_v56 = vpack.c.b8 %v781_v44, %v781_v44 }
  0x5f   : > { %v773_v15 = vpack.c.b16 %v742_v9, %v741_v8 }
  0x60   : > { %vm808_vm3 = vnez %v782_v56 }
  0x61   : > { %1694 = vmatmul.mubr.msk.f32.gmra.mxu0 %vm409_vm0, %v362_v35  ;;  %v774_v17 = vpack.c.b8 %v773_v15, %v773_v15 }
  0x62   : > { %1695 = vmatprep.mubr.msk.f32.mxu0 %vm409_vm0, %v363_v37 }
  0x63   : > { %vm804_vm6 = vnez %v774_v17  ;;  %v824_v17 = vsel %vm808_vm3, 16843009, %v2067_v2 }
  0x64   : > { %v820_v28 = vsel %vm804_vm6, 16843009, %v2067_v2  ;;  %v845_v29 = vunpack.c.0.s8 %v824_v17  ;;  %v846_v30 = vunpack.c.1.s8 %v824_v17 }
  0x65   : > { %1696 = vmatmul.mubr.msk.f32.gmra.mxu0 %vm409_vm0, %v363_v37  ;;  %v837_v34 = vunpack.c.0.s8 %v820_v28  ;;  %v838_v35 = vunpack.c.1.s8 %v820_v28 }
  0x66   : > { %1697 = vmatprep.mubr.msk.f32.mxu0 %vm409_vm0, %v364_v39 }
  0x67   : > { %vm2337_vm11 = vcmp.ne.s32.totalorder %v837_v34, 0  ;;  %vm2341_vm12 = vcmp.ne.s32.totalorder %v838_v35, 0 }
  0x69   : > { %1698 = vmatmul.mubr.msk.f32.gmra.mxu0 %vm409_vm0, %v364_v39  ;;  %v751_v39 = vunpack.c.2.s8 %v2321_v20 }
  0x6a   : > { %1699 = vmatprep.mubr.msk.f32.mxu0 %vm409_vm0, %v365_v41 }
  0x6b   : > { %v783_v54 = vpack.c.b16 %v752_v40, %v751_v39 }
  0x6d   : > { %1700 = vmatmul.mubr.msk.f32.gmra.mxu0 %vm409_vm0, %v365_v41  ;;  %v719_v41 = vld [vmem:[%s2312_s26 + $0x20] sm:$0xff]  ;;  %v784_v6 = vpack.c.b8 %v783_v54, %v783_v54  ;;  %s1652_s26 = sshll.u32 %s1423_s17, 7 }
  0x6e   : > { %1701 = vmatprep.mubr.msk.f32.mxu0 %vm409_vm0, %v366_v43  ;;  %vm727_vm13 = vnez %v719_v41  ;;  %s2750_s14 = scalar_lea.hbm %s2851_s5, %s1652_s26 }
  0x6f   : > { %v2359_v60 = vsel %vm727_vm13, 16843009, %v2067_v2  ;;  %vm809_vm6 = vnez %v784_v6  ;;  %vm878_vm13 = vcmp.ne.s32.totalorder %v846_v30, 0 }
  0x70   : > { %v755_v7 = vunpack.c.0.s8 %v2359_v60  ;;  %v757_v19 = vunpack.c.1.s8 %v2359_v60  ;;  %v825_v26 = vsel %vm809_vm6, 16843009, %v2067_v2  ;;  %v759_v35 = vunpack.c.2.s8 %v2359_v60 }
  0x71   : > { %1702 = vmatmul.mubr.msk.f32.gmra.mxu0 %vm409_vm0, %v366_v43  ;;  %v839_v43 = vunpack.c.0.s8 %v821_v36  ;;  %v847_v38 = vunpack.c.0.s8 %v825_v26  ;;  %v848_v39 = vunpack.c.1.s8 %v825_v26 }
  0x72   : > { %1703 = vmatprep.mubr.msk.f32.mxu0 %vm409_vm0, %v367_v45 }
  0x73   : > { %vm2352_vm1 = vcmp.ne.s32.totalorder %v839_v43, 0  ;;  %vm879_vm15 = vcmp.ne.s32.totalorder %v847_v38, 0 }
  0x75   : > { %1704 = vmatmul.mubr.msk.f32.gmra.mxu0 %vm409_vm0, %v367_v45 }
  0x76   : > { %1705 = vmatprep.mubr.msk.f32.mxu0 %vm409_vm0, %v368_v47 }
  0x79   : > { %1706 = vmatmul.mubr.msk.f32.gmra.mxu0 %vm409_vm0, %v368_v47 }
  0x7a   : > { %1707 = vmatprep.mubr.msk.f32.mxu0 %vm409_vm0, %v369_v49 }
  0x7d   : > { %1708 = vmatmul.mubr.msk.f32.gmra.mxu0 %vm409_vm0, %v369_v49 }
  0x7e   : > { %1709 = vmatprep.mubr.msk.f32.mxu0 %vm409_vm0, %v370_v51 }
  0x81   : > { %1710 = vmatmul.mubr.msk.f32.gmra.mxu0 %vm409_vm0, %v370_v51 }
  0x82   : > { %1711 = vmatprep.mubr.msk.f32.mxu0 %vm409_vm0, %v371_v53 }
  0x85   : > { %1712 = vmatmul.mubr.msk.f32.gmra.mxu0 %vm409_vm0, %v371_v53  ;;  %v822_v53 = vsel %vm806_vm10, 16843009, %v2067_v2  ;;  %vm729_vm10 = vnez %v721_v31 }
  0x86   : > { %1713 = vmatprep.mubr.msk.f32.mxu0 %vm409_vm0, %v372_v55  ;;  %v841_v0 = vunpack.c.0.s8 %v822_v53  ;;  %v842_v5 = vunpack.c.1.s8 %v822_v53  ;;  %v2419_v53 = vsel %vm729_vm10, 16843009, %v2067_v2 }
  0x87   : > { %v763_v1 = vunpack.c.0.s8 %v2419_v53  ;;  %v767_v30 = vunpack.c.2.s8 %v2419_v53 }
  0x88   : > { %vm873_vm4 = vcmp.ne.s32.totalorder %v841_v0, 0  ;;  %vm874_vm5 = vcmp.ne.s32.totalorder %v842_v5, 0 }
  0x89   : > { %1714 = vmatmul.mubr.msk.f32.gmra.mxu0 %vm409_vm0, %v372_v55 }
  0x8a   : > { %1715 = vmatprep.mubr.msk.f32.mxu0 %vm409_vm0, %v373_v57 }
  0x8d   : > { %1716 = vmatmul.mubr.msk.f32.gmra.mxu0 %vm409_vm0, %v373_v57 }
  0x8e   : > { %1717 = vmatprep.mubr.msk.f32.mxu0 %vm409_vm0, %v374_v59 }
  0x91   : > { %1718 = vmatmul.mubr.msk.f32.gmra.mxu0 %vm409_vm0, %v374_v59  ;;  %v754_v59 = vunpack.c.3.s8 %v2324_v21 }
  0x92   : > { %1719 = vmatprep.mubr.msk.f32.mxu0 %vm409_vm0, %v375_v61 }
  0x93   : > { %v785_v11 = vpack.c.b16 %v754_v59, %v753_v58 }
  0x95   : > { %1720 = vmatmul.mubr.msk.f32.gmra.mxu0 %vm409_vm0, %v375_v61  ;;  %v2362_v61 = vsel %vm728_vm14, 16843009, %v2067_v2  ;;  %v786_v23 = vpack.c.b8 %v785_v11, %v785_v11 }
  0x96   : > { %1721 = vmatprep.mubr.msk.f32.mxu0 %vm409_vm0, %v376_v63  ;;  %v756_v8 = vunpack.c.0.s8 %v2362_v61  ;;  %v758_v20 = vunpack.c.1.s8 %v2362_v61  ;;  %v760_v36 = vunpack.c.2.s8 %v2362_v61 }
  0x98   : > { %v787_v18 = vpack.c.b16 %v756_v8, %v755_v7  ;;  %v789_v34 = vpack.c.b16 %v758_v20, %v757_v19  ;;  %v791_v47 = vpack.c.b16 %v760_v36, %v759_v35 }
  0x99   : > { %1722 = vmatmul.mubr.msk.f32.gmra.mxu0 %vm409_vm0, %v376_v63 }
  0x9a   : > { %v788_v33 = vpack.c.b8 %v787_v18, %v787_v18  ;;  %v790_v46 = vpack.c.b8 %v789_v34, %v789_v34  ;;  %v792_v0 = vpack.c.b8 %v791_v47, %v791_v47  ;;  %v765_v18 = vunpack.c.1.s8 %v2419_v53 }
  0x9c   : > { %vm2412_vm14 = vnez %v788_v33 }
 0x11d   : > { %v620_v37 = vpop.f32.mrf.mxu0 }
 0x11e   : > { %v2345_v49 = vsel %vm867_vm8, -1e+09, %v620_v37  ;;  %vm876_vm8 = vcmp.ne.s32.totalorder %v844_v16, 0 }
 0x11f   : > { %v622_v45 = vpop.f32.mrf.mxu0 }
 0x120   : > { %v2347_v50 = vsel %vm868_vm9, -1e+09, %v622_v45  ;;  %vm810_vm9 = vnez %v786_v23 }
 0x121   : > { %v626_v51 = vpop.f32.mrf.mxu0  ;;  %v931_v52 = vmax.f32 %v2345_v49, %v2347_v50  ;;  %v826_v44 = vsel %vm810_vm9, 16843009, %v2067_v2 }
 0x122   : > { %v2366_v62 = vsel %vm2337_vm11, -1e+09, %v626_v51  ;;  %vm730_vm11 = vnez %v722_v32  ;;  %v761_v51 = vunpack.c.3.s8 %v2359_v60  ;;  %v849_v59 = vunpack.c.0.s8 %v826_v44 }
 0x123   : > { %932 = vmax.xlane.f32.xlu0 %v931_v52  ;;  %v628_v57 = vpop.f32.mrf.mxu0  ;;  %v762_v52 = vunpack.c.3.s8 %v2362_v61  ;;  %v2422_v54 = vsel %vm730_vm11, 16843009, %v2067_v2  ;;  %v850_v60 = vunpack.c.1.s8 %v826_v44  ;;  %v827_v61 = vsel %vm2412_vm14, 16843009, %v2067_v2 }
 0x124   : > { %v2370_v63 = vsel %vm2341_vm12, -1e+09, %v628_v57  ;;  %vm877_vm12 = vcmp.ne.s32.totalorder %v845_v29, 0  ;;  %v851_v8 = vunpack.c.0.s8 %v827_v61  ;;  %vm881_vm3 = vcmp.ne.s32.totalorder %v849_v59, 0 }
 0x125   : > { %v632_v3 = vpop.f32.mrf.mxu0  ;;  %v934_v4 = vmax.f32 %v2366_v62, %v2370_v63  ;;  %v793_v5 = vpack.c.b16 %v762_v52, %v761_v51  ;;  %v766_v19 = vunpack.c.1.s8 %v2422_v54  ;;  %v768_v31 = vunpack.c.2.s8 %v2422_v54 }
 0x126   : > { %v2379_v12 = vsel %vm2352_vm1, -1e+09, %v632_v3  ;;  %vm880_vm1 = vcmp.ne.s32.totalorder %v848_v39, 0  ;;  %v764_v3 = vunpack.c.0.s8 %v2422_v54  ;;  %vm883_vm6 = vcmp.ne.s32.totalorder %v851_v8, 0 }
 0x127   : > { %935 = vmax.xlane.f32.xlu0 %v934_v4  ;;  %v634_v9 = vpop.f32.mrf.mxu0  ;;  %v794_v17 = vpack.c.b8 %v793_v5, %v793_v5  ;;  %v797_v33 = vpack.c.b16 %v766_v19, %v765_v18  ;;  %v770_v47 = vunpack.c.3.s8 %v2422_v54 }
 0x128   : > { %v2381_v13 = vsel %vm872_vm2, -1e+09, %v634_v9  ;;  %vm812_vm2 = vnez %v790_v46  ;;  %v852_v9 = vunpack.c.1.s8 %v827_v61  ;;  %v769_v46 = vunpack.c.3.s8 %v2419_v53 }
 0x129   : > { %v638_v14 = vpop.f32.mrf.mxu0  ;;  %v937_v15 = vmax.f32 %v2379_v12, %v2381_v13  ;;  %v798_v45 = vpack.c.b8 %v797_v33, %v797_v33 }
 0x12a   : > { %v2392_v24 = vsel %vm873_vm4, -1e+09, %v638_v14  ;;  %vm882_vm4 = vcmp.ne.s32.totalorder %v850_v60, 0  ;;  %v828_v14 = vsel %vm812_vm2, 16843009, %v2067_v2  ;;  %v801_v53 = vpack.c.b16 %v770_v47, %v769_v46 }
 0x12b   : > { %938 = vmax.xlane.f32.xlu1 %v937_v15  ;;  %v640_v21 = vpop.f32.mrf.mxu0  ;;  %v795_v15 = vpack.c.b16 %v764_v3, %v763_v1  ;;  %v853_v26 = vunpack.c.0.s8 %v828_v14  ;;  %vm816_vm14 = vnez %v798_v45 }
 0x12c   : > { %v2394_v25 = vsel %vm874_vm5, -1e+09, %v640_v21  ;;  %vm813_vm5 = vnez %v792_v0 }
 0x12d   : > { %v644_v27 = vpop.f32.mrf.mxu0  ;;  %v940_v28 = vmax.f32 %v2392_v24, %v2394_v25  ;;  %v796_v29 = vpack.c.b8 %v795_v15, %v795_v15  ;;  %vm885_vm9 = vcmp.ne.s32.totalorder %v853_v26, 0 }
 0x12e   : > { %v2405_v40 = vsel %vm2388_vm7, -1e+09, %v644_v27  ;;  %vm884_vm7 = vcmp.ne.s32.totalorder %v852_v9, 0  ;;  %v854_v27 = vunpack.c.1.s8 %v828_v14  ;;  %v832_v9 = vsel %vm816_vm14, 16843009, %v2067_v2 }
 0x12f   : > { %941 = vmax.xlane.f32.xlu1 %v940_v28  ;;  %v646_v37 = vpop.f32.mrf.mxu0  ;;  %v829_v28 = vsel %vm813_vm5, 16843009, %v2067_v2  ;;  %vm815_vm11 = vnez %v796_v29  ;;  %v861_v18 = vunpack.c.0.s8 %v832_v9  ;;  %v862_v19 = vunpack.c.1.s8 %v832_v9  ;;  %v1230_v9 = vld [vmem:[%s2513_s10 + $0xd8] sm:$0xff] }
 0x130   : > { %v2407_v41 = vsel %vm876_vm8, -1e+09, %v646_v37  ;;  %vm814_vm8 = vnez %v794_v17  ;;  %v855_v36 = vunpack.c.0.s8 %v829_v28  ;;  %v856_v37 = vunpack.c.1.s8 %v829_v28 }
 0x131   : > { %v650_v42 = vpop.f32.mrf.mxu0  ;;  %v943_v43 = vmax.f32 %v2405_v40, %v2407_v41  ;;  %vm886_vm10 = vcmp.ne.s32.totalorder %v854_v27, 0  ;;  %v831_v60 = vsel %vm815_vm11, 16843009, %v2067_v2 }
 0x132   : > { %v2424_v55 = vsel %vm877_vm12, -1e+09, %v650_v42  ;;  %v830_v42 = vsel %vm814_vm8, 16843009, %v2067_v2  ;;  %vm887_vm12 = vcmp.ne.s32.totalorder %v855_v36, 0  ;;  %v859_v3 = vunpack.c.0.s8 %v831_v60 }
 0x133   : > { %944 = vmax.xlane.f32.xlu0 %v943_v43  ;;  %v652_v48 = vpop.f32.mrf.mxu0  ;;  %v799_v43 = vpack.c.b16 %v768_v31, %v767_v30  ;;  %v858_v59 = vunpack.c.1.s8 %v830_v42 }
 0x134   : > { %v2426_v56 = vsel %vm878_vm13, -1e+09, %v652_v48  ;;  %vm888_vm13 = vcmp.ne.s32.totalorder %v856_v37, 0 }
 0x135   : > { %v656_v57 = vpop.f32.mrf.mxu0  ;;  %v946_v58 = vmax.f32 %v2424_v55, %v2426_v56  ;;  %v800_v61 = vpack.c.b8 %v799_v43, %v799_v43 }
 0x136   : > { %v2435_v6 = vsel %vm879_vm15, -1e+09, %v656_v57 }
 0x137   : > { %947 = vmax.xlane.f32.xlu1 %v946_v58  ;;  %v658_v4 = vpop.f32.mrf.mxu0  ;;  %v857_v58 = vunpack.c.0.s8 %v830_v42  ;;  %vm817_vm2 = vnez %v800_v61  ;;  %v1218_v61 = vld [vmem:[%s2513_s10 + $0x78] sm:$0xff] }
 0x138   : > { %v2437_v7 = vsel %vm880_vm1, -1e+09, %v658_v4  ;;  %v860_v4 = vunpack.c.1.s8 %v831_v60  ;;  %vm890_vm1 = vcmp.ne.s32.totalorder %v858_v59, 0  ;;  %v1234_v60 = vld [vmem:[%s2513_s10 + $0xf8] sm:$0xff] }
 0x139   : > { %v662_v10 = vpop.f32.mrf.mxu0  ;;  %v949_v11 = vmax.f32 %v2435_v6, %v2437_v7  ;;  %vm889_vm15 = vcmp.ne.s32.totalorder %v857_v58, 0  ;;  %1723 = vmatprep.subr.mxu1 %v1234_v60 }
 0x13a   : > { %v2444_v20 = vsel %vm881_vm3, -1e+09, %v662_v10  ;;  %vm891_vm3 = vcmp.ne.s32.totalorder %v859_v3, 0  ;;  %1724 = vmatpush3.msra.mxu1 %v1218_v61  ;;  %v1232_v3 = vld [vmem:[%s2513_s10 + $0xe8] sm:$0xff] }
 0x13b   : > { %950 = vmax.xlane.f32.xlu0 %v949_v11  ;;  %v664_v16 = vpop.f32.mrf.mxu0  ;;  %v802_v11 = vpack.c.b8 %v801_v53, %v801_v53  ;;  %v1217_v53 = vld [vmem:[%s2513_s10 + $0x70] sm:$0xff] }
 0x13c   : > { %v2446_v21 = vsel %vm882_vm4, -1e+09, %v664_v16  ;;  %vm892_vm4 = vcmp.ne.s32.totalorder %v860_v4, 0  ;;  %v1216_v4 = vld [vmem:[%s2513_s10 + $0x68] sm:$0xff] }
 0x13d   : > { %v668_v22 = vpop.f32.mrf.mxu0  ;;  %v952_v23 = vmax.f32 %v2444_v20, %v2446_v21  ;;  %vm818_vm5 = vnez %v802_v11  ;;  %v1229_v11 = vld [vmem:[%s2513_s10 + $0xd0] sm:$0xff] }
 0x13e   : > { %v2453_v34 = vsel %vm883_vm6, -1e+09, %v668_v22  ;;  %v833_v22 = vsel %vm817_vm2, 16843009, %v2067_v2  ;;  %vm893_vm6 = vcmp.ne.s32.totalorder %v861_v18, 0  ;;  %v1212_v18 = vld [vmem:[%s2513_s10 + $0x48] sm:$0xff] }
 0x13f   : > { %953 = vmax.xlane.f32.xlu1 %v952_v23  ;;  %v670_v32 = vpop.f32.mrf.mxu0  ;;  %v863_v28 = vunpack.c.0.s8 %v833_v22  ;;  %v864_v31 = vunpack.c.1.s8 %v833_v22 }
 0x140   : > { %v2455_v35 = vsel %vm884_vm7, -1e+09, %v670_v32  ;;  %vm894_vm7 = vcmp.ne.s32.totalorder %v862_v19, 0  ;;  %v834_v32 = vsel %vm818_vm5, 16843009, %v2067_v2  ;;  %v1227_v19 = vld [vmem:[%s2513_s10 + $0xc0] sm:$0xff] }
 0x141   : > { %v674_v38 = vpop.f32.mrf.mxu0  ;;  %v955_v39 = vmax.f32 %v2453_v34, %v2455_v35  ;;  %vm895_vm8 = vcmp.ne.s32.totalorder %v863_v28, 0  ;;  %v865_v42 = vunpack.c.0.s8 %v834_v32  ;;  %v866_v43 = vunpack.c.1.s8 %v834_v32 }
 0x142   : > { %v2462_v48 = vsel %vm885_vm9, -1e+09, %v674_v38  ;;  %vm896_vm9 = vcmp.ne.s32.totalorder %v864_v31, 0 }
 0x143   : > { %956 = vmax.xlane.f32.xlu0 %v955_v39  ;;  %v676_v44 = vpop.f32.mrf.mxu0  ;;  %vm898_vm11 = vcmp.ne.s32.totalorder %v866_v43, 0 }
 0x144   : > { %v2464_v51 = vsel %vm886_vm10, -1e+09, %v676_v44  ;;  %vm897_vm10 = vcmp.ne.s32.totalorder %v865_v42, 0 }
 0x145   : > { %v680_v52 = vpop.f32.mrf.mxu0  ;;  %v958_v57 = vmax.f32 %v2462_v48, %v2464_v51 }
 0x146   : > { %v2469_v54 = vsel %vm887_vm12, -1e+09, %v680_v52 }
 0x147   : > { %959 = vmax.xlane.f32.xlu1 %v958_v57  ;;  %v682_v0 = vpop.f32.mrf.mxu0 }
 0x148   : > { %v2471_v1 = vsel %vm888_vm13, -1e+09, %v682_v0  ;;  %v1233_v0 = vld [vmem:[%s2513_s10 + $0xf0] sm:$0xff] }
 0x149   : > { %v686_v5 = vpop.f32.mrf.mxu0  ;;  %v961_v8 = vmax.f32 %v2469_v54, %v2471_v1  ;;  %1725 = vmatprep.subr.mxu1 %v1233_v0 }
 0x14a   : > { %v2476_v14 = vsel %vm889_vm15, -1e+09, %v686_v5  ;;  %1726 = vmatpush3.msra.mxu1 %v1217_v53  ;;  %v1231_v5 = vld [vmem:[%s2513_s10 + $0xe0] sm:$0xff] }
 0x14b   : > { %962 = vmax.xlane.f32.xlu0 %v961_v8  ;;  %v688_v10 = vpop.f32.mrf.mxu0  ;;  %1727 = vmatprep.subr.mxu1 %v1232_v3  ;;  %v1215_v8 = vld [vmem:[%s2513_s10 + $0x60] sm:$0xff] }
 0x14c   : > { %v2478_v15 = vsel %vm890_vm1, -1e+09, %v688_v10  ;;  %1728 = vmatpush3.msra.mxu1 %v1216_v4  ;;  %v1214_v10 = vld [vmem:[%s2513_s10 + $0x58] sm:$0xff] }
 0x14d   : > { %v692_v16 = vpop.f32.mrf.mxu0  ;;  %v964_v17 = vmax.f32 %v2476_v14, %v2478_v15  ;;  %1729 = vmatprep.subr.mxu1 %v1231_v5 }
 0x14e   : > { %v2483_v26 = vsel %vm891_vm3, -1e+09, %v692_v16  ;;  %1730 = vmatpush3.msra.mxu1 %v1215_v8  ;;  %v1213_v16 = vld [vmem:[%s2513_s10 + $0x50] sm:$0xff] }
 0x14f   : > { %965 = vmax.xlane.f32.xlu1 %v964_v17  ;;  %v694_v23 = vpop.f32.mrf.mxu0  ;;  %1731 = vmatprep.subr.mxu1 %v1230_v9  ;;  %v1228_v17 = vld [vmem:[%s2513_s10 + $0xc8] sm:$0xff] }
 0x150   : > { %v2485_v27 = vsel %vm892_vm4, -1e+09, %v694_v23  ;;  %1732 = vmatpush3.msra.mxu1 %v1214_v10 }
 0x151   : > { %v698_v29 = vpop.f32.mrf.mxu0  ;;  %v967_v30 = vmax.f32 %v2483_v26, %v2485_v27  ;;  %1733 = vmatprep.subr.mxu1 %v1229_v11 }
 0x152   : > { %v2490_v36 = vsel %vm893_vm6, -1e+09, %v698_v29  ;;  %1734 = vmatpush3.msra.mxu1 %v1213_v16 }
 0x153   : > { %968 = vmax.xlane.f32.xlu0 %v967_v30  ;;  %v700_v33 = vpop.f32.mrf.mxu0  ;;  %1735 = vmatprep.subr.mxu1 %v1228_v17 }
 0x154   : > { %v2492_v37 = vsel %vm894_vm7, -1e+09, %v700_v33  ;;  %1736 = vmatpush3.msra.mxu1 %v1212_v18 }
 0x155   : > { %v704_v38 = vpop.f32.mrf.mxu0  ;;  %v970_v39 = vmax.f32 %v2490_v36, %v2492_v37  ;;  %1737 = vmatprep.subr.mxu1 %v1227_v19 }
 0x156   : > { %v2496_v45 = vsel %vm895_vm8, -1e+09, %v704_v38 }
 0x157   : > { %971 = vmax.xlane.f32.xlu1 %v970_v39  ;;  %v706_v44 = vpop.f32.mrf.mxu0 }
 0x158   : > { %v2498_v2 = vsel %vm896_vm9, -1e+09, %v706_v44 }
 0x159   : > { %v710_v46 = vpop.f32.mrf.mxu0  ;;  %v973_v47 = vmax.f32 %v2496_v45, %v2498_v2 }
 0x15a   : > { %v2502_v57 = vsel %vm897_vm10, -1e+09, %v710_v46 }
 0x15b   : > { %974 = vmax.xlane.f32.xlu0 %v973_v47  ;;  %v712_v52 = vpop.f32.mrf.mxu0 }
 0x15c   : > { %v2504_v58 = vsel %vm898_vm11, -1e+09, %v712_v52 }
 0x15d   : > { %v976_v59 = vmax.f32 %v2502_v57, %v2504_v58 }
 0x15f   : > { %977 = vmax.xlane.f32.xlu1 %v976_v59 }
 0x1ac   : > { %v933_v22 = vpop.xlane.xlu0 %932 }
 0x1ad   : > { %v979_v23 = vsub.f32 %v2345_v49, %v933_v22  ;;  %v980_v28 = vsub.f32 %v2347_v50, %v933_v22 }
 0x1af   : > { %v1011_v29 = vmul.f32 1.442695, %v979_v23  ;;  %v1013_v30 = vmul.f32 1.442695, %v980_v28 }
 0x1b0   : > { %v936_v31 = vpop.xlane.xlu0 %935 }
 0x1b1   : > { %1877 = vpow2.f32 %v1011_v29  ;;  %v981_v32 = vsub.f32 %v2366_v62, %v936_v31  ;;  %v982_v33 = vsub.f32 %v2370_v63, %v936_v31  ;;  %v1211_v31 = vld [vmem:[%s2513_s10 + $0x40] sm:$0xff] }
 0x1b2   : > { %1879 = vpow2.f32 %v1013_v30  ;;  %1738 = vmatpush3.msra.mxu1 %v1211_v31 }
 0x1b3   : > { %v1015_v38 = vmul.f32 1.442695, %v981_v32  ;;  %v1017_v39 = vmul.f32 1.442695, %v982_v33 }
 0x1b4   : > { %v939_v42 = vpop.xlane.xlu1 %938 }
 0x1b5   : > { %1881 = vpow2.f32 %v1015_v38  ;;  %v983_v43 = vsub.f32 %v2379_v12, %v939_v42  ;;  %v984_v44 = vsub.f32 %v2381_v13, %v939_v42  ;;  %v1226_v38 = vld [vmem:[%s2513_s10 + $0xb8] sm:$0xff] }
 0x1b6   : > { %1883 = vpow2.f32 %v1017_v39  ;;  %v1210_v39 = vld [vmem:[%s2513_s10 + $0x38] sm:$0xff]  ;;  %1739 = vmatprep.subr.mxu1 %v1226_v38 }
 0x1b7   : > { %v1019_v49 = vmul.f32 1.442695, %v983_v43  ;;  %v1021_v50 = vmul.f32 1.442695, %v984_v44  ;;  %1740 = vmatpush3.msra.mxu1 %v1210_v39 }
 0x1b8   : > { %v942_v46 = vpop.xlane.xlu1 %941 }
 0x1b9   : > { %1885 = vpow2.f32 %v1019_v49  ;;  %v985_v47 = vsub.f32 %v2392_v24, %v942_v46  ;;  %v986_v62 = vsub.f32 %v2394_v25, %v942_v46  ;;  %v1209_v46 = vld [vmem:[%s2513_s10 + $0x30] sm:$0xff] }
 0x1ba   : > { %1887 = vpow2.f32 %v1021_v50 }
 0x1bb   : > { %v1023_v63 = vmul.f32 1.442695, %v985_v47  ;;  %v1025_v52 = vmul.f32 1.442695, %v986_v62  ;;  %v1208_v62 = vld [vmem:[%s2513_s10 + $0x28] sm:$0xff] }
 0x1bc   : > { %v945_v59 = vpop.xlane.xlu0 %944 }
 0x1bd   : > { %1889 = vpow2.f32 %v1023_v63  ;;  %v987_v60 = vsub.f32 %v2405_v40, %v945_v59  ;;  %v988_v12 = vsub.f32 %v2407_v41, %v945_v59  ;;  %v1223_v63 = vld [vmem:[%s2513_s10 + $0xa0] sm:$0xff] }
 0x1be   : > { %v2540_v61 = vpop.eup %1877  ;;  %1891 = vpow2.f32 %v1025_v52 }
 0x1bf   : > { %v2542_v13 = vpop.eup %1879  ;;  %v1027_v0 = vmul.f32 1.442695, %v987_v60  ;;  %v1029_v53 = vmul.f32 1.442695, %v988_v12 }
 0x1c0   : > { %v948_v3 = vpop.xlane.xlu1 %947  ;;  %v1075_v24 = vadd.f32 %v2542_v13, %v2540_v61 }
 0x1c1   : > { %1893 = vpow2.f32 %v1027_v0  ;;  %v989_v25 = vsub.f32 %v2424_v55, %v948_v3  ;;  %v990_v4 = vsub.f32 %v2426_v56, %v948_v3  ;;  %v1207_v3 = vld [vmem:[%s2513_s10 + $0x20] sm:$0xff] }
 0x1c2   : > { %v2548_v5 = vpop.eup %1881  ;;  %1895 = vpow2.f32 %v1029_v53  ;;  %1076 = vadd.xlane.f32.xlu0 %v1075_v24 }
 0x1c3   : > { %v2550_v40 = vpop.eup %1883  ;;  %v1031_v41 = vmul.f32 1.442695, %v989_v25  ;;  %v1033_v8 = vmul.f32 1.442695, %v990_v4  ;;  %v1206_v25 = vld [vmem:[%s2513_s10 + $0x18] sm:$0xff]  ;;  %v1221_v4 = vld [vmem:[%s2513_s10 + $0x90] sm:$0xff] }
 0x1c4   : > { %v951_v9 = vpop.xlane.xlu0 %950  ;;  %v1078_v10 = vadd.f32 %v2550_v40, %v2548_v5 }
 0x1c5   : > { %1897 = vpow2.f32 %v1031_v41  ;;  %v991_v11 = vsub.f32 %v2435_v6, %v951_v9  ;;  %v992_v16 = vsub.f32 %v2437_v7, %v951_v9 }
 0x1c6   : > { %v2556_v55 = vpop.eup %1885  ;;  %1899 = vpow2.f32 %v1033_v8  ;;  %1079 = vadd.xlane.f32.xlu1 %v1078_v10 }
 0x1c7   : > { %v2558_v56 = vpop.eup %1887  ;;  %v1035_v17 = vmul.f32 1.442695, %v991_v11  ;;  %v1037_v18 = vmul.f32 1.442695, %v992_v16 }
 0x1c8   : > { %v954_v19 = vpop.xlane.xlu1 %953  ;;  %v1081_v22 = vadd.f32 %v2558_v56, %v2556_v55 }
 0x1c9   : > { %1901 = vpow2.f32 %v1035_v17  ;;  %v993_v6 = vsub.f32 %v2444_v20, %v954_v19  ;;  %v994_v7 = vsub.f32 %v2446_v21, %v954_v19  ;;  %v1225_v20 = vld [vmem:[%s2513_s10 + $0xb0] sm:$0xff]  ;;  %v1204_v19 = vld [vmem:[%s2513_s10 + $0x8] sm:$0xff] }
 0x1ca   : > { %v2564_v23 = vpop.eup %1889  ;;  %1903 = vpow2.f32 %v1037_v18  ;;  %1082 = vadd.xlane.f32.xlu0 %v1081_v22  ;;  %1741 = vmatprep.subr.mxu1 %v1225_v20  ;;  %v1205_v17 = vld [vmem:[%s2513_s10 + $0x10] sm:$0xff]  ;;  %v1219_v22 = vld [vmem:[%s2513_s10 + $0x80] sm:$0xff] }
 0x1cb   : > { %v2566_v28 = vpop.eup %1891  ;;  %v1039_v29 = vmul.f32 1.442695, %v993_v6  ;;  %v1041_v30 = vmul.f32 1.442695, %v994_v7  ;;  %1742 = vmatpush3.msra.mxu1 %v1209_v46 }
 0x1cc   : > { %v957_v32 = vpop.xlane.xlu0 %956  ;;  %v1084_v33 = vadd.f32 %v2566_v28, %v2564_v23 }
 0x1cd   : > { %1905 = vpow2.f32 %v1039_v29  ;;  %v995_v21 = vsub.f32 %v2453_v34, %v957_v32  ;;  %v996_v42 = vsub.f32 %v2455_v35, %v957_v32  ;;  %v1224_v35 = vld [vmem:[%s2513_s10 + $0xa8] sm:$0xff] }
 0x1ce   : > { %v2576_v43 = vpop.eup %1893  ;;  %1907 = vpow2.f32 %v1041_v30  ;;  %1085 = vadd.xlane.f32.xlu1 %v1084_v33  ;;  %1743 = vmatprep.subr.mxu1 %v1224_v35  ;;  %v1203_v33 = vld [vmem:[%s2513_s10] sm:$0xff] }
 0x1cf   : > { %v2578_v44 = vpop.eup %1895  ;;  %v1043_v49 = vmul.f32 1.442695, %v995_v21  ;;  %v1045_v50 = vmul.f32 1.442695, %v996_v42  ;;  %1744 = vmatpush3.msra.mxu1 %v1208_v62 }
 0x1d0   : > { %v960_v47 = vpop.xlane.xlu1 %959  ;;  %v1087_v34 = vadd.f32 %v2578_v44, %v2576_v43  ;;  %1745 = vmatprep.subr.mxu1 %v1223_v63 }
 0x1d1   : > { %1909 = vpow2.f32 %v1043_v49  ;;  %v997_v52 = vsub.f32 %v2462_v48, %v960_v47  ;;  %v998_v59 = vsub.f32 %v2464_v51, %v960_v47  ;;  %1746 = vmatpush3.msra.mxu1 %v1207_v3  ;;  %v1222_v51 = vld [vmem:[%s2513_s10 + $0x98] sm:$0xff] }
 0x1d2   : > { %v2588_v60 = vpop.eup %1897  ;;  %1911 = vpow2.f32 %v1045_v50  ;;  %1088 = vadd.xlane.f32.xlu0 %v1087_v34  ;;  %1747 = vmatprep.subr.mxu1 %v1222_v51 }
 0x1d3   : > { %v2590_v12 = vpop.eup %1899  ;;  %v1047_v0 = vmul.f32 1.442695, %v997_v52  ;;  %v1049_v53 = vmul.f32 1.442695, %v998_v59  ;;  %1748 = vmatpush3.msra.mxu1 %v1206_v25 }
 0x1d4   : > { %v963_v24 = vpop.xlane.xlu0 %962  ;;  %v1090_v48 = vadd.f32 %v2590_v12, %v2588_v60  ;;  %1749 = vmatprep.subr.mxu1 %v1221_v4 }
 0x1d5   : > { %1913 = vpow2.f32 %v1047_v0  ;;  %v999_v41 = vsub.f32 %v2469_v54, %v963_v24  ;;  %v1000_v8 = vsub.f32 %v2471_v1, %v963_v24  ;;  %1750 = vmatpush3.msra.mxu1 %v1205_v17  ;;  %v1220_v1 = vld [vmem:[%s2513_s10 + $0x88] sm:$0xff] }
 0x1d6   : > { %v2600_v9 = vpop.eup %1901  ;;  %1915 = vpow2.f32 %v1049_v53  ;;  %1091 = vadd.xlane.f32.xlu1 %v1090_v48  ;;  %1751 = vmatprep.subr.mxu1 %v1220_v1 }
 0x1d7   : > { %v2602_v10 = vpop.eup %1903  ;;  %v1051_v11 = vmul.f32 1.442695, %v999_v41  ;;  %v1053_v16 = vmul.f32 1.442695, %v1000_v8  ;;  %1752 = vmatpush3.msra.mxu1 %v1204_v19 }
 0x1d8   : > { %v966_v18 = vpop.xlane.xlu1 %965  ;;  %v1093_v54 = vadd.f32 %v2602_v10, %v2600_v9  ;;  %1753 = vmatprep.subr.mxu1 %v1219_v22 }
 0x1d9   : > { %1917 = vpow2.f32 %v1051_v11  ;;  %v1001_v6 = vsub.f32 %v2476_v14, %v966_v18  ;;  %v1002_v7 = vsub.f32 %v2478_v15, %v966_v18  ;;  %1754 = vmatpush3.msra.mxu1 %v1203_v33 }
 0x1da   : > { %v2612_v29 = vpop.eup %1905  ;;  %1919 = vpow2.f32 %v1053_v16  ;;  %1094 = vadd.xlane.f32.xlu0 %v1093_v54 }
 0x1db   : > { %v2614_v30 = vpop.eup %1907  ;;  %v1055_v31 = vmul.f32 1.442695, %v1001_v6  ;;  %v1057_v32 = vmul.f32 1.442695, %v1002_v7 }
 0x1dc   : > { %v969_v38 = vpop.xlane.xlu0 %968  ;;  %v1096_v39 = vadd.f32 %v2614_v30, %v2612_v29 }
 0x1dd   : > { %1921 = vpow2.f32 %v1055_v31  ;;  %v1003_v14 = vsub.f32 %v2483_v26, %v969_v38  ;;  %v1004_v15 = vsub.f32 %v2485_v27, %v969_v38 }
 0x1de   : > { %v2621_v20 = vpop.eup %1909  ;;  %1923 = vpow2.f32 %v1057_v32  ;;  %1097 = vadd.xlane.f32.xlu1 %v1096_v39 }
 0x1df   : > { %v2623_v21 = vpop.eup %1911  ;;  %v1059_v42 = vmul.f32 1.442695, %v1003_v14  ;;  %v1061_v49 = vmul.f32 1.442695, %v1004_v15 }
 0x1e0   : > { %v972_v50 = vpop.xlane.xlu1 %971  ;;  %v1099_v46 = vadd.f32 %v2623_v21, %v2621_v20 }
 0x1e1   : > { %1925 = vpow2.f32 %v1059_v42  ;;  %v1005_v47 = vsub.f32 %v2490_v36, %v972_v50  ;;  %v1006_v34 = vsub.f32 %v2492_v37, %v972_v50 }
 0x1e2   : > { %v2629_v26 = vpop.eup %1913  ;;  %1927 = vpow2.f32 %v1061_v49  ;;  %1100 = vadd.xlane.f32.xlu0 %v1099_v46 }
 0x1e3   : > { %v2631_v27 = vpop.eup %1915  ;;  %v1063_v35 = vmul.f32 1.442695, %v1005_v47  ;;  %v1065_v62 = vmul.f32 1.442695, %v1006_v34 }
 0x1e4   : > { %v975_v63 = vpop.xlane.xlu0 %974  ;;  %v1102_v52 = vadd.f32 %v2631_v27, %v2629_v26 }
 0x1e5   : > { %1929 = vpow2.f32 %v1063_v35  ;;  %v1007_v59 = vsub.f32 %v2496_v45, %v975_v63  ;;  %v1008_v0 = vsub.f32 %v2498_v2, %v975_v63 }
 0x1e6   : > { %v2637_v36 = vpop.eup %1917  ;;  %1931 = vpow2.f32 %v1065_v62  ;;  %1103 = vadd.xlane.f32.xlu1 %v1102_v52 }
 0x1e7   : > { %v2639_v37 = vpop.eup %1919  ;;  %v1067_v53 = vmul.f32 1.442695, %v1007_v59  ;;  %v1069_v3 = vmul.f32 1.442695, %v1008_v0 }
 0x1e8   : > { %v978_v24 = vpop.xlane.xlu1 %977  ;;  %v1105_v48 = vadd.f32 %v2639_v37, %v2637_v36 }
 0x1e9   : > { %1933 = vpow2.f32 %v1067_v53  ;;  %v1009_v51 = vsub.f32 %v2502_v57, %v978_v24  ;;  %v1010_v25 = vsub.f32 %v2504_v58, %v978_v24 }
 0x1ea   : > { %v2645_v45 = vpop.eup %1921  ;;  %1935 = vpow2.f32 %v1069_v3  ;;  %1106 = vadd.xlane.f32.xlu0 %v1105_v48 }
 0x1eb   : > { %v2647_v2 = vpop.eup %1923  ;;  %v1071_v4 = vmul.f32 1.442695, %v1009_v51  ;;  %v1073_v41 = vmul.f32 1.442695, %v1010_v25 }
 0x1ec   : > { %v1108_v8 = vadd.f32 %v2647_v2, %v2645_v45 }
 0x1ed   : > { %1937 = vpow2.f32 %v1071_v4 }
 0x1ee   : > { %v2651_v11 = vpop.eup %1925  ;;  %1939 = vpow2.f32 %v1073_v41  ;;  %1109 = vadd.xlane.f32.xlu1 %v1108_v8 }
 0x1ef   : > { %v2653_v16 = vpop.eup %1927 }
 0x1f0   : > { %v1111_v57 = vadd.f32 %v2653_v16, %v2651_v11 }
 0x1f2   : > { %v2657_v58 = vpop.eup %1929  ;;  %1112 = vadd.xlane.f32.xlu0 %v1111_v57 }
 0x1f3   : > { %v2659_v17 = vpop.eup %1931 }
 0x1f4   : > { %v1114_v18 = vadd.f32 %v2659_v17, %v2657_v58 }
 0x1f6   : > { %v2663_v54 = vpop.eup %1933  ;;  %1115 = vadd.xlane.f32.xlu1 %v1114_v18 }
 0x1f7   : > { %v2665_v1 = vpop.eup %1935 }
 0x1f8   : > { %v1117_v19 = vadd.f32 %v2665_v1, %v2663_v54 }
 0x1fa   : > { %v2669_v22 = vpop.eup %1937  ;;  %1118 = vadd.xlane.f32.xlu0 %v1117_v19 }
 0x1fb   : > { %v2671_v6 = vpop.eup %1939 }
 0x1fc   : > { %v1120_v7 = vadd.f32 %v2671_v6, %v2669_v22 }
 0x1fe   : > { %1121 = vadd.xlane.f32.xlu1 %v1120_v7 }
 0x24b   : > { %v1077_v31 = vpop.xlane.xlu0 %1076 }
 0x24c   : > { %1941 = vrcp.f32 %v1077_v31 }
 0x24f   : > { %v1080_v32 = vpop.xlane.xlu1 %1079 }
 0x250   : > { %1943 = vrcp.f32 %v1080_v32 }
 0x253   : > { %v1083_v33 = vpop.xlane.xlu0 %1082 }
 0x254   : > { %1945 = vrcp.f32 %v1083_v33 }
 0x257   : > { %v1086_v38 = vpop.xlane.xlu1 %1085 }
 0x258   : > { %1947 = vrcp.f32 %v1086_v38 }
 0x259   : > { %v1942_v39 = vpop.eup %1941 }
 0x25a   : > { %v1140_v14 = vmul.f32 %v1942_v39, %v2542_v13  ;;  %v1139_v15 = vmul.f32 %v1942_v39, %v2540_v61 }
 0x25b   : > { %v1089_v42 = vpop.xlane.xlu0 %1088 }
 0x25c   : > { %1949 = vrcp.f32 %v1089_v42  ;;  %1172 = vst [vmem:[%s2680_s12 + $0x8] sm:$0xff] %v1140_v14  ;;  %1299 = vmatprep.mubr.f32.mxu1 %v1140_v14  ;;  %1171 = vst [vmem:[%s2680_s12] sm:$0xff] %v1139_v15 }
 0x25d   : > { %v1944_v49 = vpop.eup %1943  ;;  %1300 = vmatmul.mubr.f32.vlgmr.msra.gmra.mxu1 %v1139_v15 }
 0x25e   : > { %v1142_v50 = vmul.f32 %v1944_v49, %v2550_v40  ;;  %v1141_v13 = vmul.f32 %v1944_v49, %v2548_v5 }
 0x25f   : > { %v1092_v61 = vpop.xlane.xlu1 %1091 }
 0x260   : > { %1951 = vrcp.f32 %v1092_v61  ;;  %1174 = vst [vmem:[%s2680_s12 + $0x18] sm:$0xff] %v1142_v50  ;;  %1304 = vmatprep.mubr.f32.mxu1 %v1142_v50  ;;  %1173 = vst [vmem:[%s2680_s12 + $0x10] sm:$0xff] %v1141_v13 }
 0x261   : > { %v1946_v46 = vpop.eup %1945  ;;  %1305 = vmatmul.mubr.f32.gmra.mxu1 %v1141_v13 }
 0x262   : > { %v1144_v47 = vmul.f32 %v1946_v46, %v2558_v56  ;;  %v1143_v34 = vmul.f32 %v1946_v46, %v2556_v55 }
 0x263   : > { %v1095_v35 = vpop.xlane.xlu0 %1094 }
 0x264   : > { %1953 = vrcp.f32 %v1095_v35  ;;  %1176 = vst [vmem:[%s2680_s12 + $0x28] sm:$0xff] %v1144_v47  ;;  %1309 = vmatprep.mubr.f32.mxu1 %v1144_v47  ;;  %1175 = vst [vmem:[%s2680_s12 + $0x20] sm:$0xff] %v1143_v34 }
 0x265   : > { %v1948_v5 = vpop.eup %1947  ;;  %1310 = vmatmul.mubr.f32.gmra.mxu1 %v1143_v34 }
 0x266   : > { %v1146_v40 = vmul.f32 %v1948_v5, %v2566_v28  ;;  %v1145_v62 = vmul.f32 %v1948_v5, %v2564_v23 }
 0x267   : > { %v1098_v63 = vpop.xlane.xlu1 %1097 }
 0x268   : > { %1955 = vrcp.f32 %v1098_v63  ;;  %1178 = vst [vmem:[%s2680_s12 + $0x38] sm:$0xff] %v1146_v40  ;;  %1314 = vmatprep.mubr.f32.mxu1 %v1146_v40  ;;  %1177 = vst [vmem:[%s2680_s12 + $0x30] sm:$0xff] %v1145_v62 }
 0x269   : > { %v1950_v55 = vpop.eup %1949  ;;  %1315 = vmatmul.mubr.f32.gmra.mxu1 %v1145_v62 }
 0x26a   : > { %v1148_v56 = vmul.f32 %v1950_v55, %v2578_v44  ;;  %v1147_v52 = vmul.f32 %v1950_v55, %v2576_v43 }
 0x26b   : > { %v1101_v59 = vpop.xlane.xlu0 %1100 }
 0x26c   : > { %1957 = vrcp.f32 %v1101_v59  ;;  %1180 = vst [vmem:[%s2680_s12 + $0x48] sm:$0xff] %v1148_v56  ;;  %1319 = vmatprep.mubr.f32.mxu1 %v1148_v56  ;;  %1179 = vst [vmem:[%s2680_s12 + $0x40] sm:$0xff] %v1147_v52 }
 0x26d   : > { %v1952_v23 = vpop.eup %1951  ;;  %1320 = vmatmul.mubr.f32.gmra.mxu1 %v1147_v52 }
 0x26e   : > { %v1150_v28 = vmul.f32 %v1952_v23, %v2590_v12  ;;  %v1149_v0 = vmul.f32 %v1952_v23, %v2588_v60 }
 0x26f   : > { %v1104_v53 = vpop.xlane.xlu1 %1103 }
 0x270   : > { %1959 = vrcp.f32 %v1104_v53  ;;  %1182 = vst [vmem:[%s2680_s12 + $0x58] sm:$0xff] %v1150_v28  ;;  %1324 = vmatprep.mubr.f32.mxu1 %v1150_v28  ;;  %1181 = vst [vmem:[%s2680_s12 + $0x50] sm:$0xff] %v1149_v0 }
 0x271   : > { %v1954_v43 = vpop.eup %1953  ;;  %1325 = vmatmul.mubr.f32.gmra.mxu1 %v1149_v0 }
 0x272   : > { %v1152_v44 = vmul.f32 %v1954_v43, %v2602_v10  ;;  %v1151_v3 = vmul.f32 %v1954_v43, %v2600_v9 }
 0x273   : > { %v1107_v24 = vpop.xlane.xlu0 %1106 }
 0x274   : > { %1961 = vrcp.f32 %v1107_v24  ;;  %1184 = vst [vmem:[%s2680_s12 + $0x68] sm:$0xff] %v1152_v44  ;;  %1329 = vmatprep.mubr.f32.mxu1 %v1152_v44  ;;  %1183 = vst [vmem:[%s2680_s12 + $0x60] sm:$0xff] %v1151_v3 }
 0x275   : > { %v1956_v60 = vpop.eup %1955  ;;  %1330 = vmatmul.mubr.f32.gmra.mxu1 %v1151_v3 }
 0x276   : > { %v1154_v12 = vmul.f32 %v1956_v60, %v2614_v30  ;;  %v1153_v48 = vmul.f32 %v1956_v60, %v2612_v29 }
 0x277   : > { %v1110_v51 = vpop.xlane.xlu1 %1109 }
 0x278   : > { %1963 = vrcp.f32 %v1110_v51  ;;  %1186 = vst [vmem:[%s2680_s12 + $0x78] sm:$0xff] %v1154_v12  ;;  %1334 = vmatprep.mubr.f32.mxu1 %v1154_v12  ;;  %1185 = vst [vmem:[%s2680_s12 + $0x70] sm:$0xff] %v1153_v48 }
 0x279   : > { %v1958_v9 = vpop.eup %1957  ;;  %1335 = vmatmul.mubr.f32.gmra.mxu1 %v1153_v48 }
 0x27a   : > { %v1156_v10 = vmul.f32 %v1958_v9, %v2623_v21  ;;  %v1155_v25 = vmul.f32 %v1958_v9, %v2621_v20 }
 0x27b   : > { %v1113_v4 = vpop.xlane.xlu0 %1112 }
 0x27c   : > { %1965 = vrcp.f32 %v1113_v4  ;;  %1188 = vst [vmem:[%s2680_s12 + $0x88] sm:$0xff] %v1156_v10  ;;  %1339 = vmatprep.mubr.f32.mxu1 %v1156_v10  ;;  %1187 = vst [vmem:[%s2680_s12 + $0x80] sm:$0xff] %v1155_v25 }
 0x27d   : > { %v1960_v29 = vpop.eup %1959  ;;  %1340 = vmatmul.mubr.f32.gmra.mxu1 %v1155_v25 }
 0x27e   : > { %v1158_v30 = vmul.f32 %v1960_v29, %v2631_v27  ;;  %v1157_v41 = vmul.f32 %v1960_v29, %v2629_v26 }
 0x27f   : > { %v1116_v8 = vpop.xlane.xlu1 %1115 }
 0x280   : > { %1967 = vrcp.f32 %v1116_v8  ;;  %1190 = vst [vmem:[%s2680_s12 + $0x98] sm:$0xff] %v1158_v30  ;;  %1344 = vmatprep.mubr.f32.mxu1 %v1158_v30  ;;  %1189 = vst [vmem:[%s2680_s12 + $0x90] sm:$0xff] %v1157_v41 }
 0x281   : > { %v1962_v20 = vpop.eup %1961  ;;  %1345 = vmatmul.mubr.f32.gmra.mxu1 %v1157_v41 }
 0x282   : > { %v1160_v21 = vmul.f32 %v1962_v20, %v2639_v37  ;;  %v1159_v57 = vmul.f32 %v1962_v20, %v2637_v36 }
 0x283   : > { %v1119_v18 = vpop.xlane.xlu0 %1118 }
 0x284   : > { %1969 = vrcp.f32 %v1119_v18  ;;  %1192 = vst [vmem:[%s2680_s12 + $0xa8] sm:$0xff] %v1160_v21  ;;  %1349 = vmatprep.mubr.f32.mxu1 %v1160_v21  ;;  %1191 = vst [vmem:[%s2680_s12 + $0xa0] sm:$0xff] %v1159_v57 }
 0x285   : > { %v1964_v26 = vpop.eup %1963  ;;  %1350 = vmatmul.mubr.f32.gmra.mxu1 %v1159_v57 }
 0x286   : > { %v1162_v27 = vmul.f32 %v1964_v26, %v2647_v2  ;;  %v1161_v19 = vmul.f32 %v1964_v26, %v2645_v45 }
 0x287   : > { %v1122_v7 = vpop.xlane.xlu1 %1121 }
 0x288   : > { %1971 = vrcp.f32 %v1122_v7  ;;  %1194 = vst [vmem:[%s2680_s12 + $0xb8] sm:$0xff] %v1162_v27  ;;  %1354 = vmatprep.mubr.f32.mxu1 %v1162_v27  ;;  %1193 = vst [vmem:[%s2680_s12 + $0xb0] sm:$0xff] %v1161_v19 }
 0x289   : > { %v1966_v36 = vpop.eup %1965  ;;  %1355 = vmatmul.mubr.f32.gmra.mxu1 %v1161_v19 }
 0x28a   : > { %v1164_v37 = vmul.f32 %v1966_v36, %v2653_v16  ;;  %v1163_v31 = vmul.f32 %v1966_v36, %v2651_v11 }
 0x28c   : > { %1196 = vst [vmem:[%s2680_s12 + $0xc8] sm:$0xff] %v1164_v37  ;;  %1359 = vmatprep.mubr.f32.mxu1 %v1164_v37  ;;  %1195 = vst [vmem:[%s2680_s12 + $0xc0] sm:$0xff] %v1163_v31 }
 0x28d   : > { %v1968_v2 = vpop.eup %1967  ;;  %1360 = vmatmul.mubr.f32.gmra.mxu1 %v1163_v31 }
 0x28e   : > { %v1166_v45 = vmul.f32 %v1968_v2, %v2659_v17  ;;  %v1165_v32 = vmul.f32 %v1968_v2, %v2657_v58 }
 0x290   : > { %1198 = vst [vmem:[%s2680_s12 + $0xd8] sm:$0xff] %v1166_v45  ;;  %1364 = vmatprep.mubr.f32.mxu1 %v1166_v45  ;;  %1197 = vst [vmem:[%s2680_s12 + $0xd0] sm:$0xff] %v1165_v32 }
 0x291   : > { %v1970_v16 = vpop.eup %1969  ;;  %1365 = vmatmul.mubr.f32.gmra.mxu1 %v1165_v32 }
 0x292   : > { %v1168_v11 = vmul.f32 %v1970_v16, %v2665_v1  ;;  %v1167_v33 = vmul.f32 %v1970_v16, %v2663_v54 }
 0x294   : > { %1200 = vst [vmem:[%s2680_s12 + $0xe8] sm:$0xff] %v1168_v11  ;;  %1369 = vmatprep.mubr.f32.mxu1 %v1168_v11  ;;  %1199 = vst [vmem:[%s2680_s12 + $0xe0] sm:$0xff] %v1167_v33 }
 0x295   : > { %v1972_v17 = vpop.eup %1971  ;;  %1370 = vmatmul.mubr.f32.gmra.mxu1 %v1167_v33 }
 0x296   : > { %v1170_v58 = vmul.f32 %v1972_v17, %v2671_v6  ;;  %v1169_v38 = vmul.f32 %v1972_v17, %v2669_v22 }
 0x298   : > { %1202 = vst [vmem:[%s2680_s12 + $0xf8] sm:$0xff] %v1170_v58  ;;  %1374 = vmatprep.mubr.f32.mxu1 %v1170_v58  ;;  %1201 = vst [vmem:[%s2680_s12 + $0xf0] sm:$0xff] %v1169_v38  ;;  %s1979_s12 = scalar_lea.vmem %s1978_s22, 8192 }
 0x299   : > { %1375 = vmatmul.mubr.f32.gmra.mxu1 %v1169_v38  ;;  %p1981_p6 = scmp.lt.s32.totalorder %s1979_s12, %s1973_s0 }
 0x29b   : > { %p1982_p7 = por %p1981_p6, %p1980_p5 }
 0x29d   : > { %p1983_p9 = pnand %p1982_p7, %p1976_p4 }
 0x29f   : > { %1986 = shalt.err (!%p1983_p9)
}
 0x2a0   : > { %s1987_s13 = scalar_lea.hbm %s2750_s14, 4096  ;;  %s1991_s17 = scalar_lea.hbm %s2851_s5, 32768 }
 0x2a1   : > { %p1988_p10 = scmp.ne.s32.totalorder %s2750_s14, %s1987_s13  ;;  %p1992_p13 = scmp.lt.s32.totalorder %s2750_s14, %s2851_s5 }
 0x2a2   : > { %p1993_p0 = scmp.lt.s32.totalorder %s1991_s17, %s1987_s13 }
 0x2a3   : > { %p1989_p11 = pnand %p1988_p10, %p2152_p3 }
 0x2a4   : > { %p1994_p1 = por %p1993_p0, %p1992_p13 }
 0x2a5   : > { %p1990_p12 = pneg %p1989_p11 }
 0x2a7   : > { %p1995_p2 = pnand %p1994_p1, %p1990_p12 }
 0x2a9   : > { %1998 = shalt.err (!%p1995_p2)
}
 0x2aa   : > { %s2069_s0 = smov 256   ;;  %s2070_s10 = smov 16  }
 0x2ab   : > { %1803 = dma.vmem_to_hbm [thread:$0]  (%p2152_p3), %s2752_s8, 4096, %s2750_s14, %s2756_s30, %s2069_s0, %s2069_s0, %s2070_s10  }
 0x2ac   : > { %s2867_s21 = sshll.u32 %s2190_s27, 3 }
 0x2ad   : > { %s2784_s15 = scalar_lea.vmem %s2850_s4, %s2867_s21 }
 0x31d   : > { %v1755_v54 = vpop.f32.mrf.mxu1 }
 0x31f   : > { %v1756_v1 = vpop.f32.mrf.mxu1 }
 0x320   : > { %v1757_v22 = vadd.f32 %v1756_v1, %v1755_v54 }
 0x321   : > { %v1758_v6 = vpop.f32.mrf.mxu1 }
 0x322   : > { %1380 = vst.msk [vmem:[%s2784_s15] sm:$0xff] %vm409_vm0, %v1757_v22 }
 0x323   : > { %v1759_v39 = vpop.f32.mrf.mxu1 }
 0x324   : > { %v1760_v14 = vadd.f32 %v1759_v39, %v1758_v6 }
 0x325   : > { %v1761_v15 = vpop.f32.mrf.mxu1 }
 0x326   : > { %1381 = vst.msk [vmem:[%s2784_s15 + $0x8] sm:$0xff] %vm409_vm0, %v1760_v14 }
 0x327   : > { %v1762_v42 = vpop.f32.mrf.mxu1 }
 0x328   : > { %v1763_v49 = vadd.f32 %v1762_v42, %v1761_v15 }
 0x329   : > { %v1764_v50 = vpop.f32.mrf.mxu1 }
 0x32a   : > { %1382 = vst.msk [vmem:[%s2784_s15 + $0x10] sm:$0xff] %vm409_vm0, %v1763_v49 }
 0x32b   : > { %v1765_v13 = vpop.f32.mrf.mxu1 }
 0x32c   : > { %v1766_v61 = vadd.f32 %v1765_v13, %v1764_v50 }
 0x32d   : > { %v1767_v46 = vpop.f32.mrf.mxu1 }
 0x32e   : > { %1383 = vst.msk [vmem:[%s2784_s15 + $0x18] sm:$0xff] %vm409_vm0, %v1766_v61 }
 0x32f   : > { %v1768_v47 = vpop.f32.mrf.mxu1 }
 0x330   : > { %v1769_v34 = vadd.f32 %v1768_v47, %v1767_v46 }
 0x331   : > { %v1770_v35 = vpop.f32.mrf.mxu1 }
 0x332   : > { %1384 = vst.msk [vmem:[%s2784_s15 + $0x20] sm:$0xff] %vm409_vm0, %v1769_v34 }
 0x333   : > { %v1771_v5 = vpop.f32.mrf.mxu1 }
 0x334   : > { %v1772_v40 = vadd.f32 %v1771_v5, %v1770_v35 }
 0x335   : > { %v1773_v62 = vpop.f32.mrf.mxu1 }
 0x336   : > { %1385 = vst.msk [vmem:[%s2784_s15 + $0x28] sm:$0xff] %vm409_vm0, %v1772_v40 }
 0x337   : > { %v1774_v63 = vpop.f32.mrf.mxu1 }
 0x338   : > { %v1775_v55 = vadd.f32 %v1774_v63, %v1773_v62 }
 0x339   : > { %v1776_v56 = vpop.f32.mrf.mxu1 }
 0x33a   : > { %1386 = vst.msk [vmem:[%s2784_s15 + $0x30] sm:$0xff] %vm409_vm0, %v1775_v55 }
 0x33b   : > { %v1777_v52 = vpop.f32.mrf.mxu1 }
 0x33c   : > { %v1778_v59 = vadd.f32 %v1777_v52, %v1776_v56 }
 0x33d   : > { %v1779_v23 = vpop.f32.mrf.mxu1 }
 0x33e   : > { %1387 = vst.msk [vmem:[%s2784_s15 + $0x38] sm:$0xff] %vm409_vm0, %v1778_v59 }
 0x33f   : > { %v1780_v28 = vpop.f32.mrf.mxu1 }
 0x340   : > { %v1781_v0 = vadd.f32 %v1780_v28, %v1779_v23 }
 0x341   : > { %v1782_v53 = vpop.f32.mrf.mxu1 }
 0x342   : > { %1388 = vst.msk [vmem:[%s2784_s15 + $0x40] sm:$0xff] %vm409_vm0, %v1781_v0 }
 0x343   : > { %v1783_v43 = vpop.f32.mrf.mxu1 }
 0x344   : > { %v1784_v44 = vadd.f32 %v1783_v43, %v1782_v53 }
 0x345   : > { %v1785_v3 = vpop.f32.mrf.mxu1 }
 0x346   : > { %1389 = vst.msk [vmem:[%s2784_s15 + $0x48] sm:$0xff] %vm409_vm0, %v1784_v44 }
 0x347   : > { %v1786_v24 = vpop.f32.mrf.mxu1 }
 0x348   : > { %v1787_v60 = vadd.f32 %v1786_v24, %v1785_v3 }
 0x349   : > { %v1788_v12 = vpop.f32.mrf.mxu1 }
 0x34a   : > { %1390 = vst.msk [vmem:[%s2784_s15 + $0x50] sm:$0xff] %vm409_vm0, %v1787_v60 }
 0x34b   : > { %v1789_v48 = vpop.f32.mrf.mxu1 }
 0x34c   : > { %v1790_v51 = vadd.f32 %v1789_v48, %v1788_v12 }
 0x34d   : > { %v1791_v9 = vpop.f32.mrf.mxu1 }
 0x34e   : > { %1391 = vst.msk [vmem:[%s2784_s15 + $0x58] sm:$0xff] %vm409_vm0, %v1790_v51 }
 0x34f   : > { %v1792_v10 = vpop.f32.mrf.mxu1 }
 0x350   : > { %v1793_v25 = vadd.f32 %v1792_v10, %v1791_v9 }
 0x351   : > { %v1794_v4 = vpop.f32.mrf.mxu1 }
 0x352   : > { %1392 = vst.msk [vmem:[%s2784_s15 + $0x60] sm:$0xff] %vm409_vm0, %v1793_v25 }
 0x353   : > { %v1795_v29 = vpop.f32.mrf.mxu1 }
 0x354   : > { %v1796_v30 = vadd.f32 %v1795_v29, %v1794_v4 }
 0x355   : > { %v1797_v41 = vpop.f32.mrf.mxu1 }
 0x356   : > { %1393 = vst.msk [vmem:[%s2784_s15 + $0x68] sm:$0xff] %vm409_vm0, %v1796_v30 }
 0x357   : > { %v1798_v8 = vpop.f32.mrf.mxu1 }
 0x358   : > { %v1799_v20 = vadd.f32 %v1798_v8, %v1797_v41 }
 0x359   : > { %v1800_v21 = vpop.f32.mrf.mxu1 }
 0x35a   : > { %1394 = vst.msk [vmem:[%s2784_s15 + $0x70] sm:$0xff] %vm409_vm0, %v1799_v20 }
 0x35b   : > { %v1801_v57 = vpop.f32.mrf.mxu1 }
 0x35c   : > { %v1802_v18 = vadd.f32 %v1801_v57, %v1800_v21 }
 0x35e   : > { %1395 = vst.msk [vmem:[%s2784_s15 + $0x78] sm:$0xff] %vm409_vm0, %v1802_v18 }
 0x35f PF: > { %p1809_p3 = scmp.ge.s32.totalorder %s2065_s25, 2  ;;  %s1453_s6 = sand.u32 1, %s2037_s18  }
 0x360   : > { %s1454_s27 = scalar_lea.sflag [#allocation3], %s1453_s6 }
 0x361   : > { %p1806_p4 = pnand %p1809_p3, %p2161_p8 }
 0x363   : > { %p1807_p5 = pneg %p1806_p4 }
 0x365   : > { %2032 = dma.done.wait (%p1807_p5), %s1454_s27, 4096  }
 0x366   : > { %2034 = vsyncadd (%p1807_p5), %s1454_s27, 4294963200  ;;  %s19_s25 = sadd.s32 1, %s2065_s25   ;;  %s2868_s18 = smov %s2041_s19 }
 0x367   : > { %p16_p6 = scmp.ge.s32.totalorder %s19_s25, 10   ;;  %s2869_s19 = smov %s2045_s20 }
 0x368   : > { %s2870_s20 = smov %s2170_s11  ;;  %s2871_s21 = smov %s2057_s23 }
 0x369   : > { %s2872_s22 = smov %s2061_s24  ;;  %s2873_s23 = smov %s2876_s28 }
 0x36a   : > { %s2874_s24 = smov %s2880_s29  ;;  %18 = sbr.rel (!%p16_p6) target bundleno = 7 (0x7), region = 92 }
 0x36f   :  { %1459 = vsyncpa [#allocation3], 1 }
 0x370   :  { %1461 = vsyncpa [#allocation3 + $0x1], 1 }

</bundles_post_ra>
